<compile_context>
chip_gen: v7x
topology: tpu7x:2x2x1
jax: 0.10.0
libtpu: 0.0.40
codegen_flags: <defaults>
</compile_context>

<pallas_src>
import jax
import jax.numpy as jnp
from jax import lax
from jax.experimental import pallas as pl
from jax.experimental.pallas import tpu as pltpu


# ----------------------------------------------------------------------------
# Fused kernel: wavefronted LSTM layers + fc(relu(h_n[-1])) head in one body.
# Gate order follows torch: [i, f, g, o].
# ----------------------------------------------------------------------------
def _make_lstmnet_kernel(n_layers, T, B, H):
    L = n_layers
    H4 = 4 * H

    def kernel(x_ref, wih0_ref, b0_ref, wbig_ref, bbig_ref, h0_ref, c0_ref,
               wfc_ref, bfc_ref, out_ref, hn_ref, cn_ref, gx_scr):
        # ---- Hoisted layer-0 input projection (+ b0): one MXU call, off the
        #      serial recurrence. Parked in VMEM scratch to bound vreg live
        #      ranges across the unrolled wavefront loop.
        gx_scr[...] = (jnp.dot(x_ref[...], wih0_ref[...],
                               preferred_element_type=jnp.float32)
                       + b0_ref[...])

        # ---- Lane constants (hoisted): one full-width tanh implements
        #      sigmoid on i/f/o lanes (0.5*tanh(0.5x)+0.5) and tanh on g lanes.
        lane = lax.broadcasted_iota(jnp.int32, (B, H4), 1)
        is_g = jnp.logical_and(lane >= 2 * H, lane < 3 * H)
        scale = jnp.where(is_g, 1.0, 0.5).astype(jnp.float32)   # in & out scale
        shift = jnp.where(is_g, 0.0, 0.5).astype(jnp.float32)

        wbig = wbig_ref[...]                                     # (L*H, L*4H)
        bbig = jnp.broadcast_to(bbig_ref[...], (B, L * H4))      # hoisted bcast

        h_state = [h0_ref[l] for l in range(L)]                  # each (B, H)
        c_state = [c0_ref[l] for l in range(L)]

        # ---- Wavefront over (layer, time): at step w, layer l runs t = w - l.
        #      h_state[l-1] at the start of step w is exactly h_{l-1, t}.
        for w in range(T + L - 1):                               # static unroll
            hcat = (h_state[0] if L == 1
                    else jnp.concatenate(h_state, axis=1))       # (B, L*H)
            # One fused block-structured recurrent matmul for ALL layers.
            gall = jnp.dot(hcat, wbig,
                           preferred_element_type=jnp.float32) + bbig  # (B, L*4H)

            new_h = list(h_state)
            new_c = list(c_state)
            for l in range(L):
                t = w - l
                if not (0 <= t < T):
                    continue                                     # static skip
                gates = gall[:, l * H4:(l + 1) * H4]             # vreg-aligned
                if l == 0:
                    gates = gates + gx_scr[t * B:(t + 1) * B, :]
                # Single EUP push over the full (B, 4H) vreg.
                act = jnp.tanh(gates * scale) * scale + shift
                i_g = act[:, 0 * H:1 * H]
                f_g = act[:, 1 * H:2 * H]
                g_g = act[:, 2 * H:3 * H]
                o_g = act[:, 3 * H:4 * H]
                c_n = f_g * c_state[l] + i_g * g_g
                new_c[l] = c_n
                new_h[l] = o_g * jnp.tanh(c_n)
            h_state = new_h
            c_state = new_c

        for l in range(L):
            hn_ref[l] = h_state[l]
            cn_ref[l] = c_state[l]

        # fc(relu(h_n of last layer)); h_n[-1] == out[:, -1] for batch_first.
        out_ref[...] = (jnp.dot(jnp.maximum(h_state[L - 1], 0.0), wfc_ref[...],
                                preferred_element_type=jnp.float32)
                        + bfc_ref[...])

    return kernel


# ----------------------------------------------------------------------------
# Full LSTMNet forward (Pallas) and a pure-JAX reference.
# ----------------------------------------------------------------------------
@jax.jit
def lstm_net_forward(params, x_btd, h):
    h0_all, c0_all = h
    L, B, H = h0_all.shape
    T, D = x_btd.shape[1], x_btd.shape[2]
    O = params["fc_w_t"].shape[-1]
    H4 = 4 * H

    # Tiny one-time layout op: batch-first -> time-major, flattened to (T*B, D)
    # so the kernel's hoisted input projection is a single 2-D MXU matmul.
    x_flat = jnp.transpose(x_btd, (1, 0, 2)).reshape(T * B, D)

    # Fused block-structured recurrent weight. With hcat = [h_0|...|h_{L-1}]:
    #   G = hcat @ W_big,  block[l,l] = W_hh_l^T,  block[l-1,l] = W_ih_l^T.
    # Layer-0 bias is folded into the hoisted input projection; layers >=1 go
    # into bbig (added once per wavefront step to G).
    wbig = jnp.zeros((L * H, L * H4), jnp.float32)
    bbig = jnp.zeros((1, L * H4), jnp.float32)
    for i, p in enumerate(params["lstm"]):
        wbig = wbig.at[i * H:(i + 1) * H, i * H4:(i + 1) * H4].set(p["whh_t"])
        if i >= 1:
            wbig = wbig.at[(i - 1) * H:i * H, i * H4:(i + 1) * H4].set(p["wih_t"])
            bbig = bbig.at[:, i * H4:(i + 1) * H4].set(p["b"])

    args = [x_flat,
            params["lstm"][0]["wih_t"], params["lstm"][0]["b"],
            wbig, bbig, h0_all, c0_all,
            params["fc_w_t"], params["fc_b"].reshape(1, O)]

    vmem = pl.BlockSpec(memory_space=pltpu.MemorySpace.VMEM)
    out, h_n, c_n = pl.pallas_call(
        _make_lstmnet_kernel(L, T, B, H),
        out_shape=(
            jax.ShapeDtypeStruct((B, O), jnp.float32),             # fc output
            jax.ShapeDtypeStruct((L, B, H), jnp.float32),          # h_n
            jax.ShapeDtypeStruct((L, B, H), jnp.float32),          # c_n
        ),
        in_specs=[vmem] * len(args),
        out_specs=(vmem, vmem, vmem),
        scratch_shapes=[pltpu.VMEM((T * B, H4), jnp.float32)],     # gx (layer 0)
    )(*args)
    return out, (h_n, c_n)


def ref_forward(params, x_btd, h):
    h0_all, c0_all = h
    layer_in = jnp.transpose(x_btd, (1, 0, 2))            # (T, B, D)
    h_ns, c_ns = [], []
    for l, p in enumerate(params["lstm"]):
        H = h0_all.shape[-1]

        def step(carry, x_t, p=p, H=H):
            hp, cp = carry
            gates = x_t @ p["wih_t"] + hp @ p["whh_t"] + p["b"]
            i = jax.nn.sigmoid(gates[:, 0 * H:1 * H])
            f = jax.nn.sigmoid(gates[:, 1 * H:2 * H])
            g = jnp.tanh(gates[:, 2 * H:3 * H])
            o = jax.nn.sigmoid(gates[:, 3 * H:4 * H])
            c = f * cp + i * g
            hh = o * jnp.tanh(c)
            return (hh, c), hh

        (h_n, c_n), outs = lax.scan(step, (h0_all[l], c0_all[l]), layer_in)
        layer_in = outs
        h_ns.append(h_n)
        c_ns.append(c_n)
    last = layer_in[-1]
    out = jnp.maximum(last, 0.0) @ params["fc_w_t"] + params["fc_b"]
    return out, (jnp.stack(h_ns), jnp.stack(c_ns))


def init_params(key, input_dim, hidden_dim, output_dim, n_layers):
    """Deterministic init mimicking torch: U(-1/sqrt(H), 1/sqrt(H))."""
    bound = 1.0 / jnp.sqrt(hidden_dim)
    lstm_params = []
    for l in range(n_layers):
        d_in = input_dim if l == 0 else hidden_dim
        key, k1, k2, k3, k4 = jax.random.split(key, 5)
        w_ih = jax.random.uniform(k1, (4 * hidden_dim, d_in), jnp.float32, -bound, bound)
        w_hh = jax.random.uniform(k2, (4 * hidden_dim, hidden_dim), jnp.float32, -bound, bound)
        b_ih = jax.random.uniform(k3, (4 * hidden_dim,), jnp.float32, -bound, bound)
        b_hh = jax.random.uniform(k4, (4 * hidden_dim,), jnp.float32, -bound, bound)
        lstm_params.append({
            "wih_t": w_ih.T,                                  # (D, 4H)
            "whh_t": w_hh.T,                                  # (H, 4H)
            "b": (b_ih + b_hh).reshape(1, 4 * hidden_dim),    # (1, 4H)
        })
    key, k5, k6 = jax.random.split(key, 3)
    fc_bound = 1.0 / jnp.sqrt(hidden_dim)
    w_fc = jax.random.uniform(k5, (output_dim, hidden_dim), jnp.float32, -fc_bound, fc_bound)
    b_fc = jax.random.uniform(k6, (output_dim,), jnp.float32, -fc_bound, fc_bound)
    return {"lstm": lstm_params, "fc_w_t": w_fc.T, "fc_b": b_fc}


if __name__ == "__main__":
    B, T, D_IN, H, O, L = 8, 8, 16, 32, 4, 2

    key = jax.random.PRNGKey(0)
    key, kx = jax.random.split(key)
    params = init_params(key, D_IN, H, O, L)
    x = jax.random.normal(kx, (B, T, D_IN), jnp.float32)

    # init_hidden: zero (n_layers, B, H) for both h0 and c0
    h0 = jnp.zeros((L, B, H), jnp.float32)
    c0 = jnp.zeros((L, B, H), jnp.float32)

    (out, (h_n, c_n)) = lstm_net_forward(params, x, (h0, c0))
    jax.block_until_ready(out)

    out_ref, (h_ref, c_ref) = ref_forward(params, x, (h0, c0))
    assert out.shape == (B, O) and h_n.shape == (L, B, H) and c_n.shape == (L, B, H)
    assert jnp.allclose(out, out_ref, rtol=1e-4, atol=1e-5), "fc output mismatch"
    assert jnp.allclose(h_n, h_ref, rtol=1e-4, atol=1e-5), "h_n mismatch"
    assert jnp.allclose(c_n, c_ref, rtol=1e-4, atol=1e-5), "c_n mismatch"

    print("KERNEL_OK")
</pallas_src>

<mosaic_0001>
module attributes {stable_mosaic.version = 11 : i64} {
  func.func @kernel(%arg0: memref<64x16xf32, #tpu.memory_space<vmem>>, %arg1: memref<16x128xf32, #tpu.memory_space<vmem>>, %arg2: memref<1x128xf32, #tpu.memory_space<vmem>>, %arg3: memref<64x256xf32, #tpu.memory_space<vmem>>, %arg4: memref<1x256xf32, #tpu.memory_space<vmem>>, %arg5: memref<2x8x32xf32, #tpu.memory_space<vmem>>, %arg6: memref<2x8x32xf32, #tpu.memory_space<vmem>>, %arg7: memref<32x4xf32, #tpu.memory_space<vmem>>, %arg8: memref<1x4xf32, #tpu.memory_space<vmem>>, %arg9: memref<8x4xf32, #tpu.memory_space<vmem>>, %arg10: memref<2x8x32xf32, #tpu.memory_space<vmem>>, %arg11: memref<2x8x32xf32, #tpu.memory_space<vmem>>, %arg12: memref<64x128xf32, #tpu.memory_space<vmem>>) attributes {dimension_semantics = [], scalar_prefetch = 0 : i64, scratch_operands = 1 : i64, tpu.core_type = #tpu.core_type<tc>} {
    %c0 = arith.constant 0 : index
    %c0_0 = arith.constant 0 : index
    %0 = vector.load %arg0[%c0, %c0_0] : memref<64x16xf32, #tpu.memory_space<vmem>>, vector<64x16xf32>
    %c0_1 = arith.constant 0 : index
    %c0_2 = arith.constant 0 : index
    %1 = vector.load %arg1[%c0_1, %c0_2] : memref<16x128xf32, #tpu.memory_space<vmem>>, vector<16x128xf32>
    %cst = arith.constant dense<0.000000e+00> : vector<64x128xf32>
    %2 = tpu.matmul %0, %1, %cst {dimension_numbers = #tpu.dot_dimension_numbers<[1], [0], [0], [1], [0, 0, 1, 1], [], []>} : vector<64x16xf32>, vector<16x128xf32>, vector<64x128xf32> -> vector<64x128xf32>
    %c0_3 = arith.constant 0 : index
    %c0_4 = arith.constant 0 : index
    %3 = vector.load %arg2[%c0_3, %c0_4] : memref<1x128xf32, #tpu.memory_space<vmem>>, vector<1x128xf32>
    %4 = vector.broadcast %3 : vector<1x128xf32> to vector<64x128xf32>
    %5 = arith.addf %2, %4 : vector<64x128xf32>
    %c0_5 = arith.constant 0 : index
    %c0_6 = arith.constant 0 : index
    %6 = vector.load %arg12[%c0_5, %c0_6] : memref<64x128xf32, #tpu.memory_space<vmem>>, vector<64x128xf32>
    tpu.vector_store %arg12[%c0_5, %c0_6], %5 {strides = array<i32>} : memref<64x128xf32, #tpu.memory_space<vmem>>, vector<64x128xf32>,
    %7 = tpu.iota {dimensions = array<i32: 1>} : vector<8x128xi32>
    %c64_i32 = arith.constant 64 : i32
    %8 = vector.broadcast %c64_i32 : i32 to vector<8x128xi32>
    %9 = arith.cmpi sge, %7, %8 : vector<8x128xi32>
    %c96_i32 = arith.constant 96 : i32
    %10 = vector.broadcast %c96_i32 : i32 to vector<8x128xi32>
    %11 = arith.cmpi slt, %7, %10 : vector<8x128xi32>
    %12 = arith.andi %9, %11 : vector<8x128xi1>
    %cst_7 = arith.constant 1.000000e+00 : f32
    %cst_8 = arith.constant 5.000000e-01 : f32
    %13 = vector.broadcast %cst_7 : f32 to vector<8x128xf32>
    %14 = vector.broadcast %cst_8 : f32 to vector<8x128xf32>
    %15 = arith.select %12, %13, %14 : vector<8x128xi1>, vector<8x128xf32>
    %cst_9 = arith.constant 0.000000e+00 : f32
    %cst_10 = arith.constant 5.000000e-01 : f32
    %16 = vector.broadcast %cst_9 : f32 to vector<8x128xf32>
    %17 = vector.broadcast %cst_10 : f32 to vector<8x128xf32>
    %18 = arith.select %12, %16, %17 : vector<8x128xi1>, vector<8x128xf32>
    %c0_11 = arith.constant 0 : index
    %c0_12 = arith.constant 0 : index
    %19 = vector.load %arg3[%c0_11, %c0_12] : memref<64x256xf32, #tpu.memory_space<vmem>>, vector<64x256xf32>
    %c0_13 = arith.constant 0 : index
    %c0_14 = arith.constant 0 : index
    %20 = vector.load %arg4[%c0_13, %c0_14] : memref<1x256xf32, #tpu.memory_space<vmem>>, vector<1x256xf32>
    %21 = vector.shape_cast %20 : vector<1x256xf32> to vector<1x256xf32>
    %22 = vector.broadcast %21 : vector<1x256xf32> to vector<8x256xf32>
    %c0_15 = arith.constant 0 : index
    %c0_16 = arith.constant 0 : index
    %c0_17 = arith.constant 0 : index
    %23 = vector.load %arg5[%c0_15, %c0_16, %c0_17] : memref<2x8x32xf32, #tpu.memory_space<vmem>>, vector<1x8x32xf32>
    %24 = vector.shape_cast %23 : vector<1x8x32xf32> to vector<8x32xf32>
    %c1 = arith.constant 1 : index
    %c0_18 = arith.constant 0 : index
    %c0_19 = arith.constant 0 : index
    %25 = vector.load %arg5[%c1, %c0_18, %c0_19] : memref<2x8x32xf32, #tpu.memory_space<vmem>>, vector<1x8x32xf32>
    %26 = vector.shape_cast %25 : vector<1x8x32xf32> to vector<8x32xf32>
    %c0_20 = arith.constant 0 : index
    %c0_21 = arith.constant 0 : index
    %c0_22 = arith.constant 0 : index
    %27 = vector.load %arg6[%c0_20, %c0_21, %c0_22] : memref<2x8x32xf32, #tpu.memory_space<vmem>>, vector<1x8x32xf32>
    %28 = vector.shape_cast %27 : vector<1x8x32xf32> to vector<8x32xf32>
    %c1_23 = arith.constant 1 : index
    %c0_24 = arith.constant 0 : index
    %c0_25 = arith.constant 0 : index
    %29 = vector.load %arg6[%c1_23, %c0_24, %c0_25] : memref<2x8x32xf32, #tpu.memory_space<vmem>>, vector<1x8x32xf32>
    %30 = vector.shape_cast %29 : vector<1x8x32xf32> to vector<8x32xf32>
    %31 = tpu.concatenate %24, %26 in 1 : vector<8x32xf32>, vector<8x32xf32> -> vector<8x64xf32>
    %cst_26 = arith.constant dense<0.000000e+00> : vector<8x256xf32>
    %32 = tpu.matmul %31, %19, %cst_26 {dimension_numbers = #tpu.dot_dimension_numbers<[1], [0], [0], [1], [0, 0, 1, 1], [], []>} : vector<8x64xf32>, vector<64x256xf32>, vector<8x256xf32> -> vector<8x256xf32>
    %33 = arith.addf %32, %22 : vector<8x256xf32>
    %34 = vector.extract_strided_slice %33 {offsets = [0, 0], sizes = [8, 128], strides = [1, 1]} : vector<8x256xf32> to vector<8x128xf32>
    %c0_27 = arith.constant 0 : index
    %c0_28 = arith.constant 0 : index
    %35 = vector.load %arg12[%c0_27, %c0_28] : memref<64x128xf32, #tpu.memory_space<vmem>>, vector<8x128xf32>
    %36 = arith.addf %34, %35 : vector<8x128xf32>
    %37 = arith.mulf %36, %15 : vector<8x128xf32>
    %38 = math.tanh %37 : vector<8x128xf32>
    %39 = arith.mulf %38, %15 : vector<8x128xf32>
    %40 = arith.addf %39, %18 : vector<8x128xf32>
    %41 = vector.extract_strided_slice %40 {offsets = [0, 0], sizes = [8, 32], strides = [1, 1]} : vector<8x128xf32> to vector<8x32xf32>
    %42 = vector.extract_strided_slice %40 {offsets = [0, 32], sizes = [8, 32], strides = [1, 1]} : vector<8x128xf32> to vector<8x32xf32>
    %43 = vector.extract_strided_slice %40 {offsets = [0, 64], sizes = [8, 32], strides = [1, 1]} : vector<8x128xf32> to vector<8x32xf32>
    %44 = vector.extract_strided_slice %40 {offsets = [0, 96], sizes = [8, 32], strides = [1, 1]} : vector<8x128xf32> to vector<8x32xf32>
    %45 = arith.mulf %42, %28 : vector<8x32xf32>
    %46 = arith.mulf %41, %43 : vector<8x32xf32>
    %47 = arith.addf %45, %46 : vector<8x32xf32>
    %48 = math.tanh %47 : vector<8x32xf32>
    %49 = arith.mulf %44, %48 : vector<8x32xf32>
    %50 = tpu.concatenate %49, %26 in 1 : vector<8x32xf32>, vector<8x32xf32> -> vector<8x64xf32>
    %cst_29 = arith.constant dense<0.000000e+00> : vector<8x256xf32>
    %51 = tpu.matmul %50, %19, %cst_29 {dimension_numbers = #tpu.dot_dimension_numbers<[1], [0], [0], [1], [0, 0, 1, 1], [], []>} : vector<8x64xf32>, vector<64x256xf32>, vector<8x256xf32> -> vector<8x256xf32>
    %52 = arith.addf %51, %22 : vector<8x256xf32>
    %53 = vector.extract_strided_slice %52 {offsets = [0, 0], sizes = [8, 128], strides = [1, 1]} : vector<8x256xf32> to vector<8x128xf32>
    %c8 = arith.constant 8 : index
    %c0_30 = arith.constant 0 : index
    %54 = vector.load %arg12[%c8, %c0_30] : memref<64x128xf32, #tpu.memory_space<vmem>>, vector<8x128xf32>
    %55 = arith.addf %53, %54 : vector<8x128xf32>
    %56 = arith.mulf %55, %15 : vector<8x128xf32>
    %57 = math.tanh %56 : vector<8x128xf32>
    %58 = arith.mulf %57, %15 : vector<8x128xf32>
    %59 = arith.addf %58, %18 : vector<8x128xf32>
    %60 = vector.extract_strided_slice %59 {offsets = [0, 0], sizes = [8, 32], strides = [1, 1]} : vector<8x128xf32> to vector<8x32xf32>
    %61 = vector.extract_strided_slice %59 {offsets = [0, 32], sizes = [8, 32], strides = [1, 1]} : vector<8x128xf32> to vector<8x32xf32>
    %62 = vector.extract_strided_slice %59 {offsets = [0, 64], sizes = [8, 32], strides = [1, 1]} : vector<8x128xf32> to vector<8x32xf32>
    %63 = vector.extract_strided_slice %59 {offsets = [0, 96], sizes = [8, 32], strides = [1, 1]} : vector<8x128xf32> to vector<8x32xf32>
    %64 = arith.mulf %61, %47 : vector<8x32xf32>
    %65 = arith.mulf %60, %62 : vector<8x32xf32>
    %66 = arith.addf %64, %65 : vector<8x32xf32>
    %67 = math.tanh %66 : vector<8x32xf32>
    %68 = arith.mulf %63, %67 : vector<8x32xf32>
    %69 = vector.extract_strided_slice %52 {offsets = [0, 128], sizes = [8, 128], strides = [1, 1]} : vector<8x256xf32> to vector<8x128xf32>
    %70 = arith.mulf %69, %15 : vector<8x128xf32>
    %71 = math.tanh %70 : vector<8x128xf32>
    %72 = arith.mulf %71, %15 : vector<8x128xf32>
    %73 = arith.addf %72, %18 : vector<8x128xf32>
    %74 = vector.extract_strided_slice %73 {offsets = [0, 0], sizes = [8, 32], strides = [1, 1]} : vector<8x128xf32> to vector<8x32xf32>
    %75 = vector.extract_strided_slice %73 {offsets = [0, 32], sizes = [8, 32], strides = [1, 1]} : vector<8x128xf32> to vector<8x32xf32>
    %76 = vector.extract_strided_slice %73 {offsets = [0, 64], sizes = [8, 32], strides = [1, 1]} : vector<8x128xf32> to vector<8x32xf32>
    %77 = vector.extract_strided_slice %73 {offsets = [0, 96], sizes = [8, 32], strides = [1, 1]} : vector<8x128xf32> to vector<8x32xf32>
    %78 = arith.mulf %75, %30 : vector<8x32xf32>
    %79 = arith.mulf %74, %76 : vector<8x32xf32>
    %80 = arith.addf %78, %79 : vector<8x32xf32>
    %81 = math.tanh %80 : vector<8x32xf32>
    %82 = arith.mulf %77, %81 : vector<8x32xf32>
    %83 = tpu.concatenate %68, %82 in 1 : vector<8x32xf32>, vector<8x32xf32> -> vector<8x64xf32>
    %cst_31 = arith.constant dense<0.000000e+00> : vector<8x256xf32>
    %84 = tpu.matmul %83, %19, %cst_31 {dimension_numbers = #tpu.dot_dimension_numbers<[1], [0], [0], [1], [0, 0, 1, 1], [], []>} : vector<8x64xf32>, vector<64x256xf32>, vector<8x256xf32> -> vector<8x256xf32>
    %85 = arith.addf %84, %22 : vector<8x256xf32>
    %86 = vector.extract_strided_slice %85 {offsets = [0, 0], sizes = [8, 128], strides = [1, 1]} : vector<8x256xf32> to vector<8x128xf32>
    %c16 = arith.constant 16 : index
    %c0_32 = arith.constant 0 : index
    %87 = vector.load %arg12[%c16, %c0_32] : memref<64x128xf32, #tpu.memory_space<vmem>>, vector<8x128xf32>
    %88 = arith.addf %86, %87 : vector<8x128xf32>
    %89 = arith.mulf %88, %15 : vector<8x128xf32>
    %90 = math.tanh %89 : vector<8x128xf32>
    %91 = arith.mulf %90, %15 : vector<8x128xf32>
    %92 = arith.addf %91, %18 : vector<8x128xf32>
    %93 = vector.extract_strided_slice %92 {offsets = [0, 0], sizes = [8, 32], strides = [1, 1]} : vector<8x128xf32> to vector<8x32xf32>
    %94 = vector.extract_strided_slice %92 {offsets = [0, 32], sizes = [8, 32], strides = [1, 1]} : vector<8x128xf32> to vector<8x32xf32>
    %95 = vector.extract_strided_slice %92 {offsets = [0, 64], sizes = [8, 32], strides = [1, 1]} : vector<8x128xf32> to vector<8x32xf32>
    %96 = vector.extract_strided_slice %92 {offsets = [0, 96], sizes = [8, 32], strides = [1, 1]} : vector<8x128xf32> to vector<8x32xf32>
    %97 = arith.mulf %94, %66 : vector<8x32xf32>
    %98 = arith.mulf %93, %95 : vector<8x32xf32>
    %99 = arith.addf %97, %98 : vector<8x32xf32>
    %100 = math.tanh %99 : vector<8x32xf32>
    %101 = arith.mulf %96, %100 : vector<8x32xf32>
    %102 = vector.extract_strided_slice %85 {offsets = [0, 128], sizes = [8, 128], strides = [1, 1]} : vector<8x256xf32> to vector<8x128xf32>
    %103 = arith.mulf %102, %15 : vector<8x128xf32>
    %104 = math.tanh %103 : vector<8x128xf32>
    %105 = arith.mulf %104, %15 : vector<8x128xf32>
    %106 = arith.addf %105, %18 : vector<8x128xf32>
    %107 = vector.extract_strided_slice %106 {offsets = [0, 0], sizes = [8, 32], strides = [1, 1]} : vector<8x128xf32> to vector<8x32xf32>
    %108 = vector.extract_strided_slice %106 {offsets = [0, 32], sizes = [8, 32], strides = [1, 1]} : vector<8x128xf32> to vector<8x32xf32>
    %109 = vector.extract_strided_slice %106 {offsets = [0, 64], sizes = [8, 32], strides = [1, 1]} : vector<8x128xf32> to vector<8x32xf32>
    %110 = vector.extract_strided_slice %106 {offsets = [0, 96], sizes = [8, 32], strides = [1, 1]} : vector<8x128xf32> to vector<8x32xf32>
    %111 = arith.mulf %108, %80 : vector<8x32xf32>
    %112 = arith.mulf %107, %109 : vector<8x32xf32>
    %113 = arith.addf %111, %112 : vector<8x32xf32>
    %114 = math.tanh %113 : vector<8x32xf32>
    %115 = arith.mulf %110, %114 : vector<8x32xf32>
    %116 = tpu.concatenate %101, %115 in 1 : vector<8x32xf32>, vector<8x32xf32> -> vector<8x64xf32>
    %cst_33 = arith.constant dense<0.000000e+00> : vector<8x256xf32>
    %117 = tpu.matmul %116, %19, %cst_33 {dimension_numbers = #tpu.dot_dimension_numbers<[1], [0], [0], [1], [0, 0, 1, 1], [], []>} : vector<8x64xf32>, vector<64x256xf32>, vector<8x256xf32> -> vector<8x256xf32>
    %118 = arith.addf %117, %22 : vector<8x256xf32>
    %119 = vector.extract_strided_slice %118 {offsets = [0, 0], sizes = [8, 128], strides = [1, 1]} : vector<8x256xf32> to vector<8x128xf32>
    %c24 = arith.constant 24 : index
    %c0_34 = arith.constant 0 : index
    %120 = vector.load %arg12[%c24, %c0_34] : memref<64x128xf32, #tpu.memory_space<vmem>>, vector<8x128xf32>
    %121 = arith.addf %119, %120 : vector<8x128xf32>
    %122 = arith.mulf %121, %15 : vector<8x128xf32>
    %123 = math.tanh %122 : vector<8x128xf32>
    %124 = arith.mulf %123, %15 : vector<8x128xf32>
    %125 = arith.addf %124, %18 : vector<8x128xf32>
    %126 = vector.extract_strided_slice %125 {offsets = [0, 0], sizes = [8, 32], strides = [1, 1]} : vector<8x128xf32> to vector<8x32xf32>
    %127 = vector.extract_strided_slice %125 {offsets = [0, 32], sizes = [8, 32], strides = [1, 1]} : vector<8x128xf32> to vector<8x32xf32>
    %128 = vector.extract_strided_slice %125 {offsets = [0, 64], sizes = [8, 32], strides = [1, 1]} : vector<8x128xf32> to vector<8x32xf32>
    %129 = vector.extract_strided_slice %125 {offsets = [0, 96], sizes = [8, 32], strides = [1, 1]} : vector<8x128xf32> to vector<8x32xf32>
    %130 = arith.mulf %127, %99 : vector<8x32xf32>
    %131 = arith.mulf %126, %128 : vector<8x32xf32>
    %132 = arith.addf %130, %131 : vector<8x32xf32>
    %133 = math.tanh %132 : vector<8x32xf32>
    %134 = arith.mulf %129, %133 : vector<8x32xf32>
    %135 = vector.extract_strided_slice %118 {offsets = [0, 128], sizes = [8, 128], strides = [1, 1]} : vector<8x256xf32> to vector<8x128xf32>
    %136 = arith.mulf %135, %15 : vector<8x128xf32>
    %137 = math.tanh %136 : vector<8x128xf32>
    %138 = arith.mulf %137, %15 : vector<8x128xf32>
    %139 = arith.addf %138, %18 : vector<8x128xf32>
    %140 = vector.extract_strided_slice %139 {offsets = [0, 0], sizes = [8, 32], strides = [1, 1]} : vector<8x128xf32> to vector<8x32xf32>
    %141 = vector.extract_strided_slice %139 {offsets = [0, 32], sizes = [8, 32], strides = [1, 1]} : vector<8x128xf32> to vector<8x32xf32>
    %142 = vector.extract_strided_slice %139 {offsets = [0, 64], sizes = [8, 32], strides = [1, 1]} : vector<8x128xf32> to vector<8x32xf32>
    %143 = vector.extract_strided_slice %139 {offsets = [0, 96], sizes = [8, 32], strides = [1, 1]} : vector<8x128xf32> to vector<8x32xf32>
    %144 = arith.mulf %141, %113 : vector<8x32xf32>
    %145 = arith.mulf %140, %142 : vector<8x32xf32>
    %146 = arith.addf %144, %145 : vector<8x32xf32>
    %147 = math.tanh %146 : vector<8x32xf32>
    %148 = arith.mulf %143, %147 : vector<8x32xf32>
    %149 = tpu.concatenate %134, %148 in 1 : vector<8x32xf32>, vector<8x32xf32> -> vector<8x64xf32>
    %cst_35 = arith.constant dense<0.000000e+00> : vector<8x256xf32>
    %150 = tpu.matmul %149, %19, %cst_35 {dimension_numbers = #tpu.dot_dimension_numbers<[1], [0], [0], [1], [0, 0, 1, 1], [], []>} : vector<8x64xf32>, vector<64x256xf32>, vector<8x256xf32> -> vector<8x256xf32>
    %151 = arith.addf %150, %22 : vector<8x256xf32>
    %152 = vector.extract_strided_slice %151 {offsets = [0, 0], sizes = [8, 128], strides = [1, 1]} : vector<8x256xf32> to vector<8x128xf32>
    %c32 = arith.constant 32 : index
    %c0_36 = arith.constant 0 : index
    %153 = vector.load %arg12[%c32, %c0_36] : memref<64x128xf32, #tpu.memory_space<vmem>>, vector<8x128xf32>
    %154 = arith.addf %152, %153 : vector<8x128xf32>
    %155 = arith.mulf %154, %15 : vector<8x128xf32>
    %156 = math.tanh %155 : vector<8x128xf32>
    %157 = arith.mulf %156, %15 : vector<8x128xf32>
    %158 = arith.addf %157, %18 : vector<8x128xf32>
    %159 = vector.extract_strided_slice %158 {offsets = [0, 0], sizes = [8, 32], strides = [1, 1]} : vector<8x128xf32> to vector<8x32xf32>
    %160 = vector.extract_strided_slice %158 {offsets = [0, 32], sizes = [8, 32], strides = [1, 1]} : vector<8x128xf32> to vector<8x32xf32>
    %161 = vector.extract_strided_slice %158 {offsets = [0, 64], sizes = [8, 32], strides = [1, 1]} : vector<8x128xf32> to vector<8x32xf32>
    %162 = vector.extract_strided_slice %158 {offsets = [0, 96], sizes = [8, 32], strides = [1, 1]} : vector<8x128xf32> to vector<8x32xf32>
    %163 = arith.mulf %160, %132 : vector<8x32xf32>
    %164 = arith.mulf %159, %161 : vector<8x32xf32>
    %165 = arith.addf %163, %164 : vector<8x32xf32>
    %166 = math.tanh %165 : vector<8x32xf32>
    %167 = arith.mulf %162, %166 : vector<8x32xf32>
    %168 = vector.extract_strided_slice %151 {offsets = [0, 128], sizes = [8, 128], strides = [1, 1]} : vector<8x256xf32> to vector<8x128xf32>
    %169 = arith.mulf %168, %15 : vector<8x128xf32>
    %170 = math.tanh %169 : vector<8x128xf32>
    %171 = arith.mulf %170, %15 : vector<8x128xf32>
    %172 = arith.addf %171, %18 : vector<8x128xf32>
    %173 = vector.extract_strided_slice %172 {offsets = [0, 0], sizes = [8, 32], strides = [1, 1]} : vector<8x128xf32> to vector<8x32xf32>
    %174 = vector.extract_strided_slice %172 {offsets = [0, 32], sizes = [8, 32], strides = [1, 1]} : vector<8x128xf32> to vector<8x32xf32>
    %175 = vector.extract_strided_slice %172 {offsets = [0, 64], sizes = [8, 32], strides = [1, 1]} : vector<8x128xf32> to vector<8x32xf32>
    %176 = vector.extract_strided_slice %172 {offsets = [0, 96], sizes = [8, 32], strides = [1, 1]} : vector<8x128xf32> to vector<8x32xf32>
    %177 = arith.mulf %174, %146 : vector<8x32xf32>
    %178 = arith.mulf %173, %175 : vector<8x32xf32>
    %179 = arith.addf %177, %178 : vector<8x32xf32>
    %180 = math.tanh %179 : vector<8x32xf32>
    %181 = arith.mulf %176, %180 : vector<8x32xf32>
    %182 = tpu.concatenate %167, %181 in 1 : vector<8x32xf32>, vector<8x32xf32> -> vector<8x64xf32>
    %cst_37 = arith.constant dense<0.000000e+00> : vector<8x256xf32>
    %183 = tpu.matmul %182, %19, %cst_37 {dimension_numbers = #tpu.dot_dimension_numbers<[1], [0], [0], [1], [0, 0, 1, 1], [], []>} : vector<8x64xf32>, vector<64x256xf32>, vector<8x256xf32> -> vector<8x256xf32>
    %184 = arith.addf %183, %22 : vector<8x256xf32>
    %185 = vector.extract_strided_slice %184 {offsets = [0, 0], sizes = [8, 128], strides = [1, 1]} : vector<8x256xf32> to vector<8x128xf32>
    %c40 = arith.constant 40 : index
    %c0_38 = arith.constant 0 : index
    %186 = vector.load %arg12[%c40, %c0_38] : memref<64x128xf32, #tpu.memory_space<vmem>>, vector<8x128xf32>
    %187 = arith.addf %185, %186 : vector<8x128xf32>
    %188 = arith.mulf %187, %15 : vector<8x128xf32>
    %189 = math.tanh %188 : vector<8x128xf32>
    %190 = arith.mulf %189, %15 : vector<8x128xf32>
    %191 = arith.addf %190, %18 : vector<8x128xf32>
    %192 = vector.extract_strided_slice %191 {offsets = [0, 0], sizes = [8, 32], strides = [1, 1]} : vector<8x128xf32> to vector<8x32xf32>
    %193 = vector.extract_strided_slice %191 {offsets = [0, 32], sizes = [8, 32], strides = [1, 1]} : vector<8x128xf32> to vector<8x32xf32>
    %194 = vector.extract_strided_slice %191 {offsets = [0, 64], sizes = [8, 32], strides = [1, 1]} : vector<8x128xf32> to vector<8x32xf32>
    %195 = vector.extract_strided_slice %191 {offsets = [0, 96], sizes = [8, 32], strides = [1, 1]} : vector<8x128xf32> to vector<8x32xf32>
    %196 = arith.mulf %193, %165 : vector<8x32xf32>
    %197 = arith.mulf %192, %194 : vector<8x32xf32>
    %198 = arith.addf %196, %197 : vector<8x32xf32>
    %199 = math.tanh %198 : vector<8x32xf32>
    %200 = arith.mulf %195, %199 : vector<8x32xf32>
    %201 = vector.extract_strided_slice %184 {offsets = [0, 128], sizes = [8, 128], strides = [1, 1]} : vector<8x256xf32> to vector<8x128xf32>
    %202 = arith.mulf %201, %15 : vector<8x128xf32>
    %203 = math.tanh %202 : vector<8x128xf32>
    %204 = arith.mulf %203, %15 : vector<8x128xf32>
    %205 = arith.addf %204, %18 : vector<8x128xf32>
    %206 = vector.extract_strided_slice %205 {offsets = [0, 0], sizes = [8, 32], strides = [1, 1]} : vector<8x128xf32> to vector<8x32xf32>
    %207 = vector.extract_strided_slice %205 {offsets = [0, 32], sizes = [8, 32], strides = [1, 1]} : vector<8x128xf32> to vector<8x32xf32>
    %208 = vector.extract_strided_slice %205 {offsets = [0, 64], sizes = [8, 32], strides = [1, 1]} : vector<8x128xf32> to vector<8x32xf32>
    %209 = vector.extract_strided_slice %205 {offsets = [0, 96], sizes = [8, 32], strides = [1, 1]} : vector<8x128xf32> to vector<8x32xf32>
    %210 = arith.mulf %207, %179 : vector<8x32xf32>
    %211 = arith.mulf %206, %208 : vector<8x32xf32>
    %212 = arith.addf %210, %211 : vector<8x32xf32>
    %213 = math.tanh %212 : vector<8x32xf32>
    %214 = arith.mulf %209, %213 : vector<8x32xf32>
    %215 = tpu.concatenate %200, %214 in 1 : vector<8x32xf32>, vector<8x32xf32> -> vector<8x64xf32>
    %cst_39 = arith.constant dense<0.000000e+00> : vector<8x256xf32>
    %216 = tpu.matmul %215, %19, %cst_39 {dimension_numbers = #tpu.dot_dimension_numbers<[1], [0], [0], [1], [0, 0, 1, 1], [], []>} : vector<8x64xf32>, vector<64x256xf32>, vector<8x256xf32> -> vector<8x256xf32>
    %217 = arith.addf %216, %22 : vector<8x256xf32>
    %218 = vector.extract_strided_slice %217 {offsets = [0, 0], sizes = [8, 128], strides = [1, 1]} : vector<8x256xf32> to vector<8x128xf32>
    %c48 = arith.constant 48 : index
    %c0_40 = arith.constant 0 : index
    %219 = vector.load %arg12[%c48, %c0_40] : memref<64x128xf32, #tpu.memory_space<vmem>>, vector<8x128xf32>
    %220 = arith.addf %218, %219 : vector<8x128xf32>
    %221 = arith.mulf %220, %15 : vector<8x128xf32>
    %222 = math.tanh %221 : vector<8x128xf32>
    %223 = arith.mulf %222, %15 : vector<8x128xf32>
    %224 = arith.addf %223, %18 : vector<8x128xf32>
    %225 = vector.extract_strided_slice %224 {offsets = [0, 0], sizes = [8, 32], strides = [1, 1]} : vector<8x128xf32> to vector<8x32xf32>
    %226 = vector.extract_strided_slice %224 {offsets = [0, 32], sizes = [8, 32], strides = [1, 1]} : vector<8x128xf32> to vector<8x32xf32>
    %227 = vector.extract_strided_slice %224 {offsets = [0, 64], sizes = [8, 32], strides = [1, 1]} : vector<8x128xf32> to vector<8x32xf32>
    %228 = vector.extract_strided_slice %224 {offsets = [0, 96], sizes = [8, 32], strides = [1, 1]} : vector<8x128xf32> to vector<8x32xf32>
    %229 = arith.mulf %226, %198 : vector<8x32xf32>
    %230 = arith.mulf %225, %227 : vector<8x32xf32>
    %231 = arith.addf %229, %230 : vector<8x32xf32>
    %232 = math.tanh %231 : vector<8x32xf32>
    %233 = arith.mulf %228, %232 : vector<8x32xf32>
    %234 = vector.extract_strided_slice %217 {offsets = [0, 128], sizes = [8, 128], strides = [1, 1]} : vector<8x256xf32> to vector<8x128xf32>
    %235 = arith.mulf %234, %15 : vector<8x128xf32>
    %236 = math.tanh %235 : vector<8x128xf32>
    %237 = arith.mulf %236, %15 : vector<8x128xf32>
    %238 = arith.addf %237, %18 : vector<8x128xf32>
    %239 = vector.extract_strided_slice %238 {offsets = [0, 0], sizes = [8, 32], strides = [1, 1]} : vector<8x128xf32> to vector<8x32xf32>
    %240 = vector.extract_strided_slice %238 {offsets = [0, 32], sizes = [8, 32], strides = [1, 1]} : vector<8x128xf32> to vector<8x32xf32>
    %241 = vector.extract_strided_slice %238 {offsets = [0, 64], sizes = [8, 32], strides = [1, 1]} : vector<8x128xf32> to vector<8x32xf32>
    %242 = vector.extract_strided_slice %238 {offsets = [0, 96], sizes = [8, 32], strides = [1, 1]} : vector<8x128xf32> to vector<8x32xf32>
    %243 = arith.mulf %240, %212 : vector<8x32xf32>
    %244 = arith.mulf %239, %241 : vector<8x32xf32>
    %245 = arith.addf %243, %244 : vector<8x32xf32>
    %246 = math.tanh %245 : vector<8x32xf32>
    %247 = arith.mulf %242, %246 : vector<8x32xf32>
    %248 = tpu.concatenate %233, %247 in 1 : vector<8x32xf32>, vector<8x32xf32> -> vector<8x64xf32>
    %cst_41 = arith.constant dense<0.000000e+00> : vector<8x256xf32>
    %249 = tpu.matmul %248, %19, %cst_41 {dimension_numbers = #tpu.dot_dimension_numbers<[1], [0], [0], [1], [0, 0, 1, 1], [], []>} : vector<8x64xf32>, vector<64x256xf32>, vector<8x256xf32> -> vector<8x256xf32>
    %250 = arith.addf %249, %22 : vector<8x256xf32>
    %251 = vector.extract_strided_slice %250 {offsets = [0, 0], sizes = [8, 128], strides = [1, 1]} : vector<8x256xf32> to vector<8x128xf32>
    %c56 = arith.constant 56 : index
    %c0_42 = arith.constant 0 : index
    %252 = vector.load %arg12[%c56, %c0_42] : memref<64x128xf32, #tpu.memory_space<vmem>>, vector<8x128xf32>
    %253 = arith.addf %251, %252 : vector<8x128xf32>
    %254 = arith.mulf %253, %15 : vector<8x128xf32>
    %255 = math.tanh %254 : vector<8x128xf32>
    %256 = arith.mulf %255, %15 : vector<8x128xf32>
    %257 = arith.addf %256, %18 : vector<8x128xf32>
    %258 = vector.extract_strided_slice %257 {offsets = [0, 0], sizes = [8, 32], strides = [1, 1]} : vector<8x128xf32> to vector<8x32xf32>
    %259 = vector.extract_strided_slice %257 {offsets = [0, 32], sizes = [8, 32], strides = [1, 1]} : vector<8x128xf32> to vector<8x32xf32>
    %260 = vector.extract_strided_slice %257 {offsets = [0, 64], sizes = [8, 32], strides = [1, 1]} : vector<8x128xf32> to vector<8x32xf32>
    %261 = vector.extract_strided_slice %257 {offsets = [0, 96], sizes = [8, 32], strides = [1, 1]} : vector<8x128xf32> to vector<8x32xf32>
    %262 = arith.mulf %259, %231 : vector<8x32xf32>
    %263 = arith.mulf %258, %260 : vector<8x32xf32>
    %264 = arith.addf %262, %263 : vector<8x32xf32>
    %265 = math.tanh %264 : vector<8x32xf32>
    %266 = arith.mulf %261, %265 : vector<8x32xf32>
    %267 = vector.extract_strided_slice %250 {offsets = [0, 128], sizes = [8, 128], strides = [1, 1]} : vector<8x256xf32> to vector<8x128xf32>
    %268 = arith.mulf %267, %15 : vector<8x128xf32>
    %269 = math.tanh %268 : vector<8x128xf32>
    %270 = arith.mulf %269, %15 : vector<8x128xf32>
    %271 = arith.addf %270, %18 : vector<8x128xf32>
    %272 = vector.extract_strided_slice %271 {offsets = [0, 0], sizes = [8, 32], strides = [1, 1]} : vector<8x128xf32> to vector<8x32xf32>
    %273 = vector.extract_strided_slice %271 {offsets = [0, 32], sizes = [8, 32], strides = [1, 1]} : vector<8x128xf32> to vector<8x32xf32>
    %274 = vector.extract_strided_slice %271 {offsets = [0, 64], sizes = [8, 32], strides = [1, 1]} : vector<8x128xf32> to vector<8x32xf32>
    %275 = vector.extract_strided_slice %271 {offsets = [0, 96], sizes = [8, 32], strides = [1, 1]} : vector<8x128xf32> to vector<8x32xf32>
    %276 = arith.mulf %273, %245 : vector<8x32xf32>
    %277 = arith.mulf %272, %274 : vector<8x32xf32>
    %278 = arith.addf %276, %277 : vector<8x32xf32>
    %279 = math.tanh %278 : vector<8x32xf32>
    %280 = arith.mulf %275, %279 : vector<8x32xf32>
    %281 = tpu.concatenate %266, %280 in 1 : vector<8x32xf32>, vector<8x32xf32> -> vector<8x64xf32>
    %cst_43 = arith.constant dense<0.000000e+00> : vector<8x256xf32>
    %282 = tpu.matmul %281, %19, %cst_43 {dimension_numbers = #tpu.dot_dimension_numbers<[1], [0], [0], [1], [0, 0, 1, 1], [], []>} : vector<8x64xf32>, vector<64x256xf32>, vector<8x256xf32> -> vector<8x256xf32>
    %283 = arith.addf %282, %22 : vector<8x256xf32>
    %284 = vector.extract_strided_slice %283 {offsets = [0, 128], sizes = [8, 128], strides = [1, 1]} : vector<8x256xf32> to vector<8x128xf32>
    %285 = arith.mulf %284, %15 : vector<8x128xf32>
    %286 = math.tanh %285 : vector<8x128xf32>
    %287 = arith.mulf %286, %15 : vector<8x128xf32>
    %288 = arith.addf %287, %18 : vector<8x128xf32>
    %289 = vector.extract_strided_slice %288 {offsets = [0, 0], sizes = [8, 32], strides = [1, 1]} : vector<8x128xf32> to vector<8x32xf32>
    %290 = vector.extract_strided_slice %288 {offsets = [0, 32], sizes = [8, 32], strides = [1, 1]} : vector<8x128xf32> to vector<8x32xf32>
    %291 = vector.extract_strided_slice %288 {offsets = [0, 64], sizes = [8, 32], strides = [1, 1]} : vector<8x128xf32> to vector<8x32xf32>
    %292 = vector.extract_strided_slice %288 {offsets = [0, 96], sizes = [8, 32], strides = [1, 1]} : vector<8x128xf32> to vector<8x32xf32>
    %293 = arith.mulf %290, %278 : vector<8x32xf32>
    %294 = arith.mulf %289, %291 : vector<8x32xf32>
    %295 = arith.addf %293, %294 : vector<8x32xf32>
    %296 = math.tanh %295 : vector<8x32xf32>
    %297 = arith.mulf %292, %296 : vector<8x32xf32>
    %c0_44 = arith.constant 0 : index
    %c0_45 = arith.constant 0 : index
    %c0_46 = arith.constant 0 : index
    %298 = vector.load %arg10[%c0_44, %c0_45, %c0_46] : memref<2x8x32xf32, #tpu.memory_space<vmem>>, vector<1x8x32xf32>
    %299 = vector.shape_cast %298 : vector<1x8x32xf32> to vector<8x32xf32>
    %300 = vector.shape_cast %266 : vector<8x32xf32> to vector<1x8x32xf32>
    tpu.vector_store %arg10[%c0_44, %c0_45, %c0_46], %300 {strides = array<i32>} : memref<2x8x32xf32, #tpu.memory_space<vmem>>, vector<1x8x32xf32>,
    %c0_47 = arith.constant 0 : index
    %c0_48 = arith.constant 0 : index
    %c0_49 = arith.constant 0 : index
    %301 = vector.load %arg11[%c0_47, %c0_48, %c0_49] : memref<2x8x32xf32, #tpu.memory_space<vmem>>, vector<1x8x32xf32>
    %302 = vector.shape_cast %301 : vector<1x8x32xf32> to vector<8x32xf32>
    %303 = vector.shape_cast %264 : vector<8x32xf32> to vector<1x8x32xf32>
    tpu.vector_store %arg11[%c0_47, %c0_48, %c0_49], %303 {strides = array<i32>} : memref<2x8x32xf32, #tpu.memory_space<vmem>>, vector<1x8x32xf32>,
    %c1_50 = arith.constant 1 : index
    %c0_51 = arith.constant 0 : index
    %c0_52 = arith.constant 0 : index
    %304 = vector.load %arg10[%c1_50, %c0_51, %c0_52] : memref<2x8x32xf32, #tpu.memory_space<vmem>>, vector<1x8x32xf32>
    %305 = vector.shape_cast %304 : vector<1x8x32xf32> to vector<8x32xf32>
    %306 = vector.shape_cast %297 : vector<8x32xf32> to vector<1x8x32xf32>
    tpu.vector_store %arg10[%c1_50, %c0_51, %c0_52], %306 {strides = array<i32>} : memref<2x8x32xf32, #tpu.memory_space<vmem>>, vector<1x8x32xf32>,
    %c1_53 = arith.constant 1 : index
    %c0_54 = arith.constant 0 : index
    %c0_55 = arith.constant 0 : index
    %307 = vector.load %arg11[%c1_53, %c0_54, %c0_55] : memref<2x8x32xf32, #tpu.memory_space<vmem>>, vector<1x8x32xf32>
    %308 = vector.shape_cast %307 : vector<1x8x32xf32> to vector<8x32xf32>
    %309 = vector.shape_cast %295 : vector<8x32xf32> to vector<1x8x32xf32>
    tpu.vector_store %arg11[%c1_53, %c0_54, %c0_55], %309 {strides = array<i32>} : memref<2x8x32xf32, #tpu.memory_space<vmem>>, vector<1x8x32xf32>,
    %cst_56 = arith.constant 0.000000e+00 : f32
    %310 = vector.broadcast %cst_56 : f32 to vector<8x32xf32>
    %311 = arith.maximumf %297, %310 : vector<8x32xf32>
    %c0_57 = arith.constant 0 : index
    %c0_58 = arith.constant 0 : index
    %312 = vector.load %arg7[%c0_57, %c0_58] : memref<32x4xf32, #tpu.memory_space<vmem>>, vector<32x4xf32>
    %cst_59 = arith.constant dense<0.000000e+00> : vector<8x4xf32>
    %313 = tpu.matmul %311, %312, %cst_59 {dimension_numbers = #tpu.dot_dimension_numbers<[1], [0], [0], [1], [0, 0, 1, 1], [], []>} : vector<8x32xf32>, vector<32x4xf32>, vector<8x4xf32> -> vector<8x4xf32>
    %c0_60 = arith.constant 0 : index
    %c0_61 = arith.constant 0 : index
    %314 = vector.load %arg8[%c0_60, %c0_61] : memref<1x4xf32, #tpu.memory_space<vmem>>, vector<1x4xf32>
    %315 = vector.broadcast %314 : vector<1x4xf32> to vector<8x4xf32>
    %316 = arith.addf %313, %315 : vector<8x4xf32>
    %c0_62 = arith.constant 0 : index
    %c0_63 = arith.constant 0 : index
    %317 = vector.load %arg9[%c0_62, %c0_63] : memref<8x4xf32, #tpu.memory_space<vmem>>, vector<8x4xf32>
    tpu.vector_store %arg9[%c0_62, %c0_63], %316 {strides = array<i32>} : memref<8x4xf32, #tpu.memory_space<vmem>>, vector<8x4xf32>,
    return
  }
}

</mosaic_0001>

<bundles_post_ra>
// kernel: lstm_net_forward.1
= control target key start
LH: loop header
LB: loop body
LE: loop exit
PB: predicated region body
PF: predicated region fallthrough
CT: control target
= control target key end

     0   :  { %17 = vsyncpa [#allocation4], 0  ;;  %s1816_s23 = smov 32   ;;  %v1817_v11 = vmov 0.0   ;;  %vm54_vm0 = vcmask 130048   ;;  %s2348_s0 = inlined_call_operand.vmem [shape: f32[64,16], index: 0, kind: input, shape index: {}]   ;;  %s2349_s1 = inlined_call_operand.vmem [shape: f32[16,128], index: 1, kind: input, shape index: {}]   ;;  %s2350_s2 = inlined_call_operand.vmem [shape: f32[1,128], index: 2, kind: input, shape index: {}]   ;;  %s2351_s3 = inlined_call_operand.vmem [shape: f32[64,256], index: 3, kind: input, shape index: {}]   ;;  %s2352_s4 = inlined_call_operand.vmem [shape: f32[1,256], index: 4, kind: input, shape index: {}]   ;;  %s2353_s5 = inlined_call_operand.vmem [shape: f32[2,8,32], index: 5, kind: input, shape index: {}]   ;;  %s2354_s6 = inlined_call_operand.vmem [shape: f32[2,8,32], index: 6, kind: input, shape index: {}]   ;;  %s2355_s7 = inlined_call_operand.vmem [shape: f32[32,4], index: 7, kind: input, shape index: {}]   ;;  %s2356_s8 = inlined_call_operand.vmem [shape: f32[1,4], index: 8, kind: input, shape index: {}]   ;;  %s2357_s9 = inlined_call_operand.vmem [shape: f32[8,4], index: 9, kind: output, shape index: {0}]   ;;  %s2358_s10 = inlined_call_operand.hbm [shape: f32[2,8,32], index: 10, kind: output, shape index: {1}]   ;;  %s2359_s11 = inlined_call_operand.hbm [shape: f32[2,8,32], index: 11, kind: output, shape index: {2}]  }
   0x1   :  { %v1484_v0 = vld [vmem:[%s2353_s5 + $0x8] sm:$0xff]  ;;  %v202_v2 = vld [vmem:[%s2351_s3 + $0x18] sm:$0xff]  ;;  %v199_v4 = vld [vmem:[%s2351_s3] sm:$0xff]  ;;  %307 = vmatprep.mubr.f32.mxu1 %v1817_v11 }
   0x2   :  { %v200_v1 = vld [vmem:[%s2351_s3 + $0x8] sm:$0xff]  ;;  %234 = vrot.lane.b32.xlu0 %v1484_v0, %s1816_s23  ;;  %v201_v5 = vld [vmem:[%s2351_s3 + $0x10] sm:$0xff]  ;;  %v206_v8 = vld [vmem:[%s2351_s3 + $0x38] sm:$0xff] }
   0x3   :  { %v1897_v3 = vpack.c.bf16 %v202_v2, %v200_v1  ;;  %v204_v6 = vld [vmem:[%s2351_s3 + $0x28] sm:$0xff]  ;;  %v1908_v7 = vpack.c.bf16 %v201_v5, %v199_v4  ;;  %v203_v9 = vld [vmem:[%s2351_s3 + $0x20] sm:$0xff]  ;;  %v205_v10 = vld [vmem:[%s2351_s3 + $0x30] sm:$0xff] }
   0x4   :  { %v1921_v12 = vpack.c.bf16 %v206_v8, %v204_v6  ;;  %v208_v13 = vld [vmem:[%s2351_s3 + $0x48] sm:$0xff]  ;;  %v210_v14 = vld [vmem:[%s2351_s3 + $0x58] sm:$0xff]  ;;  %v1930_v15 = vpack.c.bf16 %v205_v10, %v203_v9  ;;  %v45_v16 = vld [vmem:[%s2349_s1] sm:$0xff] }
   0x5   :  { %1544 = vmatprep.subr.bf16.mxu1 %v1897_v3  ;;  %v46_v17 = vld [vmem:[%s2349_s1 + $0x8] sm:$0xff]  ;;  %v1939_v18 = vpack.c.bf16 %v210_v14, %v208_v13  ;;  %v207_v19 = vld [vmem:[%s2351_s3 + $0x40] sm:$0xff]  ;;  %v209_v20 = vld [vmem:[%s2351_s3 + $0x50] sm:$0xff] }
   0x6   :  { %1546 = vmatpush1.bf16.msra.mxu1 %v1908_v7  ;;  %v1539_v21 = vpack.c.bf16 %v46_v17, %v45_v16  ;;  %v37_v22 = vld [vmem:[%s2348_s0] sm:$0xff]  ;;  %v212_v23 = vld [vmem:[%s2351_s3 + $0x68] sm:$0xff]  ;;  %v214_v24 = vld [vmem:[%s2351_s3 + $0x78] sm:$0xff] }
   0x7   :  { %1548 = vmatprep.subr.bf16.mxu1 %v1921_v12  ;;  %1516 = vmatprep.mubr.msk.f32.mxu0 %vm54_vm0, %v37_v22  ;;  %v230_v25 = vld [vmem:[%s2354_s6] sm:$0xff] }
   0x8   :  { %1540 = vmatprep.subr.bf16.mxu0 %v1539_v21 }
   0x9   :  { %18 = vsyncpa [#allocation6], 0  ;;  %v1961_v26 = vpack.c.bf16 %v209_v20, %v207_v19  ;;  %1542 = vmatpush3.bf16.msra.mxu0 %v1539_v21  ;;  %v38_v27 = vld [vmem:[%s2348_s0 + $0x8] sm:$0xff]  ;;  %v1967_v28 = vpack.c.bf16 %v214_v24, %v212_v23  ;;  %v211_v29 = vld [vmem:[%s2351_s3 + $0x60] sm:$0xff]  ;;  %320 = vrot.lane.b32.xlu1 %v230_v25, %s1816_s23  ;;  %vm237_vm1 = vcmask 261120   ;;  %vm239_vm2 = vcmask 523264  }
   0xa   :  { %1550 = vmatpush1.bf16.msra.mxu1 %v1930_v15  ;;  %v213_v30 = vld [vmem:[%s2351_s3 + $0x70] sm:$0xff]  ;;  %1560 = vmatprep.subr.bf16.mxu0 %v1897_v3  ;;  %v227_v32 = vld [vmem:[%s2353_s5] sm:$0xff]  ;;  %v192_v37 = vlaneseq  ;;  %v1818_v48 = vmov 0.5   ;;  %v40_v63 = vld [vmem:[%s2348_s0 + $0x18] sm:$0xff]  ;;  %vm1821_vm6 = vmmov 0   ;;  %s1822_s27 = smov 96  }
   0xb   :  { %1552 = vmatprep.subr.bf16.mxu1 %v1939_v18  ;;  %v1979_v31 = vpack.c.bf16 %v213_v30, %v211_v29  ;;  %v2017_v41 = vld [vmem:[%s2352_s4] sm:$0x3]  ;;  %v39_v62 = vld [vmem:[%s2348_s0 + $0x10] sm:$0xff]  ;;  %v42_v1 = vld [vmem:[%s2348_s0 + $0x28] sm:$0xff] }
   0xc   :  { %1517 = vmatmul.mubr.msk.f32.vlgmr.msra.gmra.mrb[0].mxu0 %vm54_vm0, %v38_v27  ;;  %v2011_v38 = vshrl.u32 %v192_v37, 7  ;;  %v193_v39 = vand.u32 127, %v192_v37  ;;  %v2022_v42 = vld [vmem:[%s2350_s2] ss:$0 sm:$0xff]  ;;  %s1819_s2 = smov 64   ;;  %v43_v2 = vld [vmem:[%s2348_s0 + $0x30] sm:$0xff] }
   0xd   :  { %1562 = vmatpush1.bf16.msra.mxu0 %v1908_v7  ;;  %v41_v0 = vld [vmem:[%s2348_s0 + $0x20] sm:$0xff]  ;;  %1519 = vmatprep.mubr.msk.f32.mxu0 %vm54_vm0, %v39_v62  ;;  %v44_v4 = vld [vmem:[%s2348_s0 + $0x38] sm:$0xff] }
   0xe   :  { %1554 = vmatpush1.bf16.msra.mxu1 %v1961_v26  ;;  %1564 = vmatprep.subr.bf16.mxu0 %v1921_v12  ;;  %v219_v40 = vsub.s32 0, %v2011_v38  ;;  %vm194_vm3 = vcmp.ge.s32.totalorder %v193_v39, 64  ;;  %vm195_vm4 = vcmp.lt.s32.totalorder %v193_v39, 96  ;;  %v223_v21 = vsub.s32 1, %v2011_v38 }
   0xf   :  { %1556 = vmatprep.subr.bf16.mxu1 %v1967_v28  ;;  %vm196_vm5 = vmand %vm194_vm3, %vm195_vm4 }
  0x10   :  { %v2025_v43 = vrot.slane %v2017_v41, %v219_v40  ;;  %v2029_v49 = vsel %vm196_vm5, 1.0, %v1818_v48  ;;  %v2032_v53 = vsel %vm196_vm5, 0.0, %v1818_v48  ;;  %1520 = vmatmul.mubr.msk.f32.gmra.mrb[2].mxu0 %vm54_vm0, %v40_v63  ;;  %v2094_v22 = vrot.slane %v2017_v41, %v223_v21  ;;  %v1485_v40 = vld [vmem:[%s2354_s6 + $0x8] sm:$0xff] }
  0x11   :  { %1566 = vmatpush1.bf16.msra.mxu0 %v1930_v15  ;;  %1522 = vmatprep.mubr.msk.f32.mxu0 %vm54_vm0, %v41_v0 }
  0x12   :  { %1558 = vmatpush1.bf16.msra.mxu1 %v1979_v31  ;;  %1568 = vmatprep.subr.bf16.mxu0 %v1939_v18 }
  0x13   :  { %1576 = vmatprep.subr.bf16.mxu1 %v1897_v3 }
  0x14   :  { %1523 = vmatmul.mubr.msk.f32.gmra.mrb[4].mxu0 %vm54_vm0, %v42_v1 }
  0x15   :  { %1570 = vmatpush1.bf16.msra.mxu0 %v1961_v26  ;;  %1525 = vmatprep.mubr.msk.f32.mxu0 %vm54_vm0, %v43_v2 }
  0x16   :  { %1572 = vmatprep.subr.bf16.mxu0 %v1967_v28 }
  0x18   :  { %1526 = vmatmul.mubr.msk.f32.gmra.mrb[6].mxu0 %vm54_vm0, %v44_v4 }
  0x19   :  { %1574 = vmatpush1.bf16.msra.mxu0 %v1979_v31  ;;  %412 = vmatprep.mubr.f32.mxu0 %v1817_v11 }
  0x1a   :  { %1592 = vmatprep.subr.bf16.mxu0 %v1897_v3 }
  0x74   :  { %v1995_v33 = vpop.permute.xlu0 %234 }
  0x75   :  { %v238_v34 = vsel %vm237_vm1, %v227_v32, %v1995_v33 }
  0x76   :  { %1486 = vmatmul.mubr.msk.f32.vlgmr.msra.gmra.mrb[0].mxu1 %vm239_vm2, %v238_v34 }
  0x77   :  { %1578 = vmatpush1.bf16.msra.mxu1 %v1908_v7  ;;  %543 = vmatprep.mubr.f32.mxu1 %v1817_v11 }
  0x78   :  { %1580 = vmatprep.subr.bf16.mxu1 %v1921_v12 }
  0x7b   :  { %1582 = vmatpush1.bf16.msra.mxu1 %v1930_v15  ;;  %v321_v58 = vpop.permute.xlu1 %320 }
  0x7c   :  { %1584 = vmatprep.subr.bf16.mxu1 %v1939_v18 }
  0x7f   :  { %1586 = vmatpush1.bf16.msra.mxu1 %v1961_v26 }
  0x80   :  { %1588 = vmatprep.subr.bf16.mxu1 %v1967_v28 }
  0x83   :  { %1590 = vmatpush1.bf16.msra.mxu1 %v1979_v31 }
  0x84   :  { %1608 = vmatprep.subr.bf16.mxu1 %v1897_v3 }
  0xdf   :  { %v2009_v35 = vpop.f32.mrb[0].mxu0 }
  0xe0   :  { %v145_v36 = vpop.f32.mrb[1].mxu0  ;;  %v151_v24 = vadd.f32 %v2009_v35, %v2022_v42 }
  0xe1   :  { %v146_v44 = vadd.f32 %v2022_v42, %v145_v36 }
  0xe3   :  { %v2068_v9 = vpop.f32.mrb[2].mxu0 }
  0xe4   :  { %v2070_v10 = vpop.f32.mrb[3].mxu0 }
  0xe5   :  { %v156_v2 = vadd.f32 %v2022_v42, %v2070_v10 }
  0xe7   :  { %v2072_v13 = vpop.f32.mrb[4].mxu0 }
  0xe8   :  { %v2074_v14 = vpop.f32.mrb[5].mxu0 }
  0xeb   :  { %v2076_v16 = vpop.f32.mrb[6].mxu0 }
  0xec   :  { %v2078_v17 = vpop.f32.mrb[7].mxu0 }
 0x149   :  { %v309_v45 = vpop.f32.mrb[0].mxu1 }
 0x14a   :  { %v310_v46 = vadd.f32 %v309_v45, %v2025_v43  ;;  %v311_v47 = vpop.f32.mrb[1].mxu1 }
 0x14c   :  { %v314_v50 = vadd.f32 %v310_v46, %v146_v44 }
 0x14e   :  { %v315_v51 = vmul.f32 %v314_v50, %v2029_v49 }
 0x150   :  { %1704 = vtanh.f32 %v315_v51 }
 0x15a   :  { %v1705_v52 = vpop.eup %1704 }
 0x15b   :  { %v317_v54 = vmul.f32 %v1705_v52, %v2029_v49 }
 0x15d   :  { %v318_v55 = vadd.f32 %v317_v54, %v2032_v53 }
 0x15f   :  { %325 = vrot.lane.b32.xlu0 %v318_v55, %s1819_s2  ;;  %v323_v59 = vmul.f32 %v321_v58, %v318_v55 }
 0x1d1   :  { %v326_v56 = vpop.permute.xlu0 %325 }
 0x1d2   :  { %v328_v57 = vmul.f32 %v326_v56, %v318_v55 }
 0x1d4   :  { %330 = vrot.lane.b32.xlu1 %v328_v57, %s1816_s23 }
 0x246   :  { %v331_v60 = vpop.permute.xlu1 %330 }
 0x247   :  { %v2038_v61 = vadd.f32 %v331_v60, %v323_v59 }
 0x249   :  { %1706 = vtanh.f32 %v2038_v61 }
 0x253   :  { %v1707_v5 = vpop.eup %1706 }
 0x254   :  { %336 = vrot.lane.b32.xlu0 %v1707_v5, %s1819_s2 }
 0x2c6   :  { %v337_v6 = vpop.permute.xlu0 %336 }
 0x2c7   :  { %v339_v8 = vmul.f32 %v337_v6, %v318_v55 }
 0x2c9   :  { %341 = vrot.lane.b32.xlu1 %v339_v8, %s1816_s23 }
 0x33b   :  { %v342_v19 = vpop.permute.xlu1 %341 }
 0x33c   :  { %v344_v20 = vsel %vm237_vm1, %v342_v19, %v1995_v33 }
 0x33d   :  { %1487 = vmatmul.mubr.msk.f32.vlgmr.msra.gmra.mrb[8].mxu0 %vm239_vm2, %v344_v20 }
 0x33e   :  { %1594 = vmatpush1.bf16.msra.mxu0 %v1908_v7  ;;  %670 = vmatprep.mubr.f32.mxu0 %v1817_v11 }
 0x33f   :  { %1596 = vmatprep.subr.bf16.mxu0 %v1921_v12 }
 0x342   :  { %1598 = vmatpush1.bf16.msra.mxu0 %v1930_v15 }
 0x343   :  { %1600 = vmatprep.subr.bf16.mxu0 %v1939_v18 }
 0x346   :  { %1602 = vmatpush1.bf16.msra.mxu0 %v1961_v26 }
 0x347   :  { %1604 = vmatprep.subr.bf16.mxu0 %v1967_v28 }
 0x34a   :  { %1606 = vmatpush1.bf16.msra.mxu0 %v1979_v31 }
 0x34b   :  { %1624 = vmatprep.subr.bf16.mxu0 %v1897_v3 }
 0x410   :  { %v414_v23 = vpop.f32.mrb[8].mxu0 }
 0x411   :  { %v415_v25 = vadd.f32 %v414_v23, %v2025_v43  ;;  %v416_v27 = vpop.f32.mrb[9].mxu0 }
 0x412   :  { %v417_v29 = vadd.f32 %v416_v27, %v2094_v22 }
 0x413   :  { %v420_v30 = vadd.f32 %v415_v25, %v151_v24 }
 0x414   :  { %v442_v32 = vmul.f32 %v417_v29, %v2029_v49 }
 0x415   :  { %v421_v33 = vmul.f32 %v420_v30, %v2029_v49 }
 0x416   :  { %1708 = vtanh.f32 %v442_v32 }
 0x417   :  { %1710 = vtanh.f32 %v421_v33 }
 0x420   :  { %v1709_v34 = vpop.eup %1708 }
 0x421   :  { %v1711_v36 = vpop.eup %1710  ;;  %v444_v37 = vmul.f32 %v1709_v34, %v2029_v49 }
 0x422   :  { %v423_v38 = vmul.f32 %v1711_v36, %v2029_v49 }
 0x423   :  { %v445_v35 = vadd.f32 %v444_v37, %v2032_v53 }
 0x424   :  { %v424_v39 = vadd.f32 %v423_v38, %v2032_v53 }
 0x425   :  { %452 = vrot.lane.b32.xlu1 %v445_v35, %s1819_s2 }
 0x426   :  { %427 = vrot.lane.b32.xlu0 %v424_v39, %s1819_s2  ;;  %v425_v51 = vmul.f32 %v424_v39, %v2038_v61 }
 0x42a   :  { %447 = vrot.lane.b32.xlu0 %v1485_v40, %s1816_s23 }
 0x497   :  { %v453_v41 = vpop.permute.xlu1 %452 }
 0x498   :  { %v455_v44 = vmul.f32 %v453_v41, %v445_v35  ;;  %v428_v45 = vpop.permute.xlu0 %427 }
 0x499   :  { %v430_v46 = vmul.f32 %v428_v45, %v424_v39 }
 0x49a   :  { %457 = vrot.lane.b32.xlu0 %v455_v44, %s1816_s23 }
 0x49b   :  { %432 = vrot.lane.b32.xlu1 %v430_v46, %s1816_s23 }
 0x49c   :  { %v448_v47 = vpop.permute.xlu0 %447 }
 0x49d   :  { %v450_v48 = vmul.f32 %v448_v47, %v445_v35 }
 0x50c   :  { %v458_v50 = vpop.permute.xlu0 %457 }
 0x50d   :  { %v460_v52 = vadd.f32 %v458_v50, %v450_v48  ;;  %v433_v54 = vpop.permute.xlu1 %432 }
 0x50e   :  { %v435_v55 = vadd.f32 %v433_v54, %v425_v51  ;;  %v161_v54 = vadd.f32 %v2068_v9, %v2022_v42 }
 0x50f   :  { %1712 = vtanh.f32 %v460_v52 }
 0x510   :  { %1714 = vtanh.f32 %v435_v55 }
 0x519   :  { %v1713_v56 = vpop.eup %1712 }
 0x51a   :  { %v1715_v57 = vpop.eup %1714  ;;  %463 = vrot.lane.b32.xlu0 %v1713_v56, %s1819_s2 }
 0x51b   :  { %438 = vrot.lane.b32.xlu1 %v1715_v57, %s1819_s2 }
 0x58c   :  { %v464_v58 = vpop.permute.xlu0 %463 }
 0x58d   :  { %v466_v59 = vmul.f32 %v464_v58, %v445_v35  ;;  %v439_v60 = vpop.permute.xlu1 %438 }
 0x58e   :  { %v441_v62 = vmul.f32 %v439_v60, %v424_v39 }
 0x58f   :  { %472 = vrot.lane.b32.xlu0 %v466_v59, %s1819_s2 }
 0x590   :  { %468 = vrot.lane.b32.xlu1 %v441_v62, %s1816_s23 }
 0x601   :  { %v473_v61 = vpop.permute.xlu0 %472 }
 0x602   :  { %v469_v63 = vpop.permute.xlu1 %468 }
 0x603   :  { %v475_v0 = vsel %vm237_vm1, %v469_v63, %v473_v61 }
 0x604   :  { %1488 = vmatmul.mubr.msk.f32.vlgmr.msra.gmra.mrb[2].mxu1 %vm239_vm2, %v475_v0 }
 0x605   :  { %1610 = vmatpush1.bf16.msra.mxu1 %v1908_v7  ;;  %797 = vmatprep.mubr.f32.mxu1 %v1817_v11 }
 0x606   :  { %1612 = vmatprep.subr.bf16.mxu1 %v1921_v12 }
 0x609   :  { %1614 = vmatpush1.bf16.msra.mxu1 %v1930_v15 }
 0x60a   :  { %1616 = vmatprep.subr.bf16.mxu1 %v1939_v18 }
 0x60d   :  { %1618 = vmatpush1.bf16.msra.mxu1 %v1961_v26 }
 0x60e   :  { %1620 = vmatprep.subr.bf16.mxu1 %v1967_v28 }
 0x611   :  { %1622 = vmatpush1.bf16.msra.mxu1 %v1979_v31 }
 0x612   :  { %1640 = vmatprep.subr.bf16.mxu1 %v1897_v3 }
 0x6d7   :  { %v545_v1 = vpop.f32.mrb[2].mxu1 }
 0x6d8   :  { %v546_v4 = vadd.f32 %v545_v1, %v2025_v43  ;;  %v547_v5 = vpop.f32.mrb[3].mxu1 }
 0x6d9   :  { %v548_v6 = vadd.f32 %v547_v5, %v2094_v22 }
 0x6da   :  { %v551_v8 = vadd.f32 %v546_v4, %v156_v2 }
 0x6db   :  { %v573_v19 = vmul.f32 %v548_v6, %v2029_v49 }
 0x6dc   :  { %v552_v20 = vmul.f32 %v551_v8, %v2029_v49 }
 0x6dd   :  { %1716 = vtanh.f32 %v573_v19 }
 0x6de   :  { %1718 = vtanh.f32 %v552_v20 }
 0x6e7   :  { %v1717_v21 = vpop.eup %1716 }
 0x6e8   :  { %v1719_v23 = vpop.eup %1718  ;;  %v575_v24 = vmul.f32 %v1717_v21, %v2029_v49 }
 0x6e9   :  { %v554_v25 = vmul.f32 %v1719_v23, %v2029_v49 }
 0x6ea   :  { %v576_v10 = vadd.f32 %v575_v24, %v2032_v53 }
 0x6eb   :  { %v555_v27 = vadd.f32 %v554_v25, %v2032_v53 }
 0x6ec   :  { %579 = vrot.lane.b32.xlu0 %v576_v10, %s1819_s2  ;;  %v577_v34 = vmul.f32 %v576_v10, %v460_v52 }
 0x6ed   :  { %558 = vrot.lane.b32.xlu1 %v555_v27, %s1819_s2  ;;  %v556_v37 = vmul.f32 %v555_v27, %v435_v55 }
 0x75e   :  { %v580_v29 = vpop.permute.xlu0 %579 }
 0x75f   :  { %v582_v30 = vmul.f32 %v580_v29, %v576_v10  ;;  %v559_v32 = vpop.permute.xlu1 %558 }
 0x760   :  { %v561_v33 = vmul.f32 %v559_v32, %v555_v27 }
 0x761   :  { %584 = vrot.lane.b32.xlu0 %v582_v30, %s1816_s23 }
 0x762   :  { %563 = vrot.lane.b32.xlu1 %v561_v33, %s1816_s23 }
 0x7d3   :  { %v585_v36 = vpop.permute.xlu0 %584 }
 0x7d4   :  { %v587_v38 = vadd.f32 %v585_v36, %v577_v34  ;;  %v564_v35 = vpop.permute.xlu1 %563 }
 0x7d5   :  { %v566_v39 = vadd.f32 %v564_v35, %v556_v37 }
 0x7d6   :  { %1720 = vtanh.f32 %v587_v38 }
 0x7d7   :  { %1722 = vtanh.f32 %v566_v39 }
 0x7e0   :  { %v1721_v40 = vpop.eup %1720 }
 0x7e1   :  { %v1723_v41 = vpop.eup %1722  ;;  %590 = vrot.lane.b32.xlu0 %v1721_v40, %s1819_s2 }
 0x7e2   :  { %569 = vrot.lane.b32.xlu1 %v1723_v41, %s1819_s2 }
 0x853   :  { %v591_v44 = vpop.permute.xlu0 %590 }
 0x854   :  { %v593_v45 = vmul.f32 %v591_v44, %v576_v10  ;;  %v570_v46 = vpop.permute.xlu1 %569 }
 0x855   :  { %v572_v47 = vmul.f32 %v570_v46, %v555_v27 }
 0x856   :  { %599 = vrot.lane.b32.xlu0 %v593_v45, %s1819_s2 }
 0x857   :  { %595 = vrot.lane.b32.xlu1 %v572_v47, %s1816_s23 }
 0x8c8   :  { %v600_v48 = vpop.permute.xlu0 %599 }
 0x8c9   :  { %v596_v50 = vpop.permute.xlu1 %595 }
 0x8ca   :  { %v602_v51 = vsel %vm237_vm1, %v596_v50, %v600_v48 }
 0x8cb   :  { %1489 = vmatmul.mubr.msk.f32.vlgmr.msra.gmra.mrb[10].mxu0 %vm239_vm2, %v602_v51 }
 0x8cc   :  { %1626 = vmatpush1.bf16.msra.mxu0 %v1908_v7  ;;  %924 = vmatprep.mubr.f32.mxu0 %v1817_v11 }
 0x8cd   :  { %1628 = vmatprep.subr.bf16.mxu0 %v1921_v12 }
 0x8d0   :  { %1630 = vmatpush1.bf16.msra.mxu0 %v1930_v15 }
 0x8d1   :  { %1632 = vmatprep.subr.bf16.mxu0 %v1939_v18 }
 0x8d4   :  { %1634 = vmatpush1.bf16.msra.mxu0 %v1961_v26 }
 0x8d5   :  { %1636 = vmatprep.subr.bf16.mxu0 %v1967_v28 }
 0x8d8   :  { %1638 = vmatpush1.bf16.msra.mxu0 %v1979_v31 }
 0x8d9   :  { %1656 = vmatprep.subr.bf16.mxu0 %v1897_v3 }
 0x99e   :  { %v672_v52 = vpop.f32.mrb[10].mxu0 }
 0x99f   :  { %v673_v55 = vadd.f32 %v672_v52, %v2025_v43  ;;  %v674_v56 = vpop.f32.mrb[11].mxu0 }
 0x9a0   :  { %v675_v57 = vadd.f32 %v674_v56, %v2094_v22 }
 0x9a1   :  { %v678_v58 = vadd.f32 %v673_v55, %v161_v54 }
 0x9a2   :  { %v700_v59 = vmul.f32 %v675_v57, %v2029_v49 }
 0x9a3   :  { %v679_v60 = vmul.f32 %v678_v58, %v2029_v49 }
 0x9a4   :  { %1724 = vtanh.f32 %v700_v59 }
 0x9a5   :  { %1726 = vtanh.f32 %v679_v60 }
 0x9ae   :  { %v1725_v62 = vpop.eup %1724 }
 0x9af   :  { %v1727_v61 = vpop.eup %1726  ;;  %v702_v63 = vmul.f32 %v1725_v62, %v2029_v49 }
 0x9b0   :  { %v681_v0 = vmul.f32 %v1727_v61, %v2029_v49 }
 0x9b1   :  { %v703_v9 = vadd.f32 %v702_v63, %v2032_v53 }
 0x9b2   :  { %v682_v1 = vadd.f32 %v681_v0, %v2032_v53 }
 0x9b3   :  { %706 = vrot.lane.b32.xlu0 %v703_v9, %s1819_s2  ;;  %v704_v8 = vmul.f32 %v703_v9, %v587_v38  ;;  %v166_v38 = vadd.f32 %v2022_v42, %v2074_v14 }
 0x9b4   :  { %685 = vrot.lane.b32.xlu1 %v682_v1, %s1819_s2  ;;  %v683_v20 = vmul.f32 %v682_v1, %v566_v39 }
 0xa25   :  { %v707_v2 = vpop.permute.xlu0 %706 }
 0xa26   :  { %v709_v4 = vmul.f32 %v707_v2, %v703_v9  ;;  %v686_v5 = vpop.permute.xlu1 %685 }
 0xa27   :  { %v688_v6 = vmul.f32 %v686_v5, %v682_v1 }
 0xa28   :  { %711 = vrot.lane.b32.xlu0 %v709_v4, %s1816_s23 }
 0xa29   :  { %690 = vrot.lane.b32.xlu1 %v688_v6, %s1816_s23 }
 0xa9a   :  { %v712_v19 = vpop.permute.xlu0 %711 }
 0xa9b   :  { %v714_v21 = vadd.f32 %v712_v19, %v704_v8  ;;  %v691_v23 = vpop.permute.xlu1 %690  ;;  %v171_v19 = vadd.f32 %v2072_v13, %v2022_v42 }
 0xa9c   :  { %v693_v24 = vadd.f32 %v691_v23, %v683_v20 }
 0xa9d   :  { %1728 = vtanh.f32 %v714_v21 }
 0xa9e   :  { %1730 = vtanh.f32 %v693_v24 }
 0xaa7   :  { %v1729_v25 = vpop.eup %1728 }
 0xaa8   :  { %v1731_v10 = vpop.eup %1730  ;;  %717 = vrot.lane.b32.xlu0 %v1729_v25, %s1819_s2 }
 0xaa9   :  { %696 = vrot.lane.b32.xlu1 %v1731_v10, %s1819_s2 }
 0xb1a   :  { %v718_v27 = vpop.permute.xlu0 %717 }
 0xb1b   :  { %v720_v29 = vmul.f32 %v718_v27, %v703_v9  ;;  %v697_v30 = vpop.permute.xlu1 %696 }
 0xb1c   :  { %v699_v32 = vmul.f32 %v697_v30, %v682_v1 }
 0xb1d   :  { %726 = vrot.lane.b32.xlu0 %v720_v29, %s1819_s2 }
 0xb1e   :  { %722 = vrot.lane.b32.xlu1 %v699_v32, %s1816_s23 }
 0xb8f   :  { %v727_v33 = vpop.permute.xlu0 %726 }
 0xb90   :  { %v723_v34 = vpop.permute.xlu1 %722 }
 0xb91   :  { %v729_v36 = vsel %vm237_vm1, %v723_v34, %v727_v33 }
 0xb92   :  { %1490 = vmatmul.mubr.msk.f32.vlgmr.msra.gmra.mrb[4].mxu1 %vm239_vm2, %v729_v36 }
 0xb93   :  { %1642 = vmatpush1.bf16.msra.mxu1 %v1908_v7  ;;  %1051 = vmatprep.mubr.f32.mxu1 %v1817_v11 }
 0xb94   :  { %1644 = vmatprep.subr.bf16.mxu1 %v1921_v12 }
 0xb97   :  { %1646 = vmatpush1.bf16.msra.mxu1 %v1930_v15 }
 0xb98   :  { %1648 = vmatprep.subr.bf16.mxu1 %v1939_v18 }
 0xb9b   :  { %1650 = vmatpush1.bf16.msra.mxu1 %v1961_v26 }
 0xb9c   :  { %1652 = vmatprep.subr.bf16.mxu1 %v1967_v28 }
 0xb9f   :  { %1654 = vmatpush1.bf16.msra.mxu1 %v1979_v31 }
 0xba0   :  { %1672 = vmatprep.subr.bf16.mxu1 %v1897_v3 }
 0xc65   :  { %v799_v37 = vpop.f32.mrb[4].mxu1 }
 0xc66   :  { %v800_v35 = vadd.f32 %v799_v37, %v2025_v43  ;;  %v801_v39 = vpop.f32.mrb[5].mxu1 }
 0xc67   :  { %v802_v40 = vadd.f32 %v801_v39, %v2094_v22 }
 0xc68   :  { %v805_v41 = vadd.f32 %v800_v35, %v166_v38 }
 0xc69   :  { %v827_v44 = vmul.f32 %v802_v40, %v2029_v49 }
 0xc6a   :  { %v806_v45 = vmul.f32 %v805_v41, %v2029_v49 }
 0xc6b   :  { %1732 = vtanh.f32 %v827_v44 }
 0xc6c   :  { %1734 = vtanh.f32 %v806_v45 }
 0xc75   :  { %v1733_v46 = vpop.eup %1732 }
 0xc76   :  { %v1735_v47 = vpop.eup %1734  ;;  %v829_v3 = vmul.f32 %v1733_v46, %v2029_v49 }
 0xc77   :  { %v808_v48 = vmul.f32 %v1735_v47, %v2029_v49 }
 0xc78   :  { %v830_v14 = vadd.f32 %v829_v3, %v2032_v53 }
 0xc79   :  { %v809_v50 = vadd.f32 %v808_v48, %v2032_v53 }
 0xc7a   :  { %833 = vrot.lane.b32.xlu0 %v830_v14, %s1819_s2  ;;  %v831_v56 = vmul.f32 %v830_v14, %v714_v21 }
 0xc7b   :  { %812 = vrot.lane.b32.xlu1 %v809_v50, %s1819_s2  ;;  %v810_v58 = vmul.f32 %v809_v50, %v693_v24 }
 0xcec   :  { %v834_v51 = vpop.permute.xlu0 %833 }
 0xced   :  { %v836_v52 = vmul.f32 %v834_v51, %v830_v14  ;;  %v813_v54 = vpop.permute.xlu1 %812 }
 0xcee   :  { %v815_v55 = vmul.f32 %v813_v54, %v809_v50 }
 0xcef   :  { %838 = vrot.lane.b32.xlu0 %v836_v52, %s1816_s23 }
 0xcf0   :  { %817 = vrot.lane.b32.xlu1 %v815_v55, %s1816_s23 }
 0xd61   :  { %v839_v57 = vpop.permute.xlu0 %838 }
 0xd62   :  { %v841_v59 = vadd.f32 %v839_v57, %v831_v56  ;;  %v818_v60 = vpop.permute.xlu1 %817  ;;  %v176_v56 = vadd.f32 %v2022_v42, %v2078_v17 }
 0xd63   :  { %v820_v62 = vadd.f32 %v818_v60, %v810_v58 }
 0xd64   :  { %1736 = vtanh.f32 %v841_v59 }
 0xd65   :  { %1738 = vtanh.f32 %v820_v62 }
 0xd6e   :  { %v1737_v61 = vpop.eup %1736 }
 0xd6f   :  { %v1739_v63 = vpop.eup %1738  ;;  %844 = vrot.lane.b32.xlu0 %v1737_v61, %s1819_s2 }
 0xd70   :  { %823 = vrot.lane.b32.xlu1 %v1739_v63, %s1819_s2 }
 0xde1   :  { %v845_v0 = vpop.permute.xlu0 %844 }
 0xde2   :  { %v847_v9 = vmul.f32 %v845_v0, %v830_v14  ;;  %v824_v1 = vpop.permute.xlu1 %823 }
 0xde3   :  { %v826_v2 = vmul.f32 %v824_v1, %v809_v50 }
 0xde4   :  { %853 = vrot.lane.b32.xlu0 %v847_v9, %s1819_s2 }
 0xde5   :  { %849 = vrot.lane.b32.xlu1 %v826_v2, %s1816_s23 }
 0xe56   :  { %v854_v4 = vpop.permute.xlu0 %853 }
 0xe57   :  { %v850_v5 = vpop.permute.xlu1 %849 }
 0xe58   :  { %v856_v6 = vsel %vm237_vm1, %v850_v5, %v854_v4 }
 0xe59   :  { %1491 = vmatmul.mubr.msk.f32.vlgmr.msra.gmra.mrb[12].mxu0 %vm239_vm2, %v856_v6 }
 0xe5a   :  { %1658 = vmatpush1.bf16.msra.mxu0 %v1908_v7  ;;  %1178 = vmatprep.mubr.f32.mxu0 %v1817_v11 }
 0xe5b   :  { %1660 = vmatprep.subr.bf16.mxu0 %v1921_v12 }
 0xe5e   :  { %1662 = vmatpush1.bf16.msra.mxu0 %v1930_v15 }
 0xe5f   :  { %1664 = vmatprep.subr.bf16.mxu0 %v1939_v18 }
 0xe62   :  { %1666 = vmatpush1.bf16.msra.mxu0 %v1961_v26 }
 0xe63   :  { %1668 = vmatprep.subr.bf16.mxu0 %v1967_v28 }
 0xe66   :  { %1670 = vmatpush1.bf16.msra.mxu0 %v1979_v31 }
 0xf2c   :  { %v926_v8 = vpop.f32.mrb[12].mxu0 }
 0xf2d   :  { %v927_v20 = vadd.f32 %v926_v8, %v2025_v43  ;;  %v928_v21 = vpop.f32.mrb[13].mxu0 }
 0xf2e   :  { %v929_v23 = vadd.f32 %v928_v21, %v2094_v22 }
 0xf2f   :  { %v932_v24 = vadd.f32 %v927_v20, %v171_v19 }
 0xf30   :  { %v954_v25 = vmul.f32 %v929_v23, %v2029_v49 }
 0xf31   :  { %v933_v10 = vmul.f32 %v932_v24, %v2029_v49 }
 0xf32   :  { %1740 = vtanh.f32 %v954_v25 }
 0xf33   :  { %1742 = vtanh.f32 %v933_v10 }
 0xf3c   :  { %v1741_v27 = vpop.eup %1740 }
 0xf3d   :  { %v1743_v29 = vpop.eup %1742  ;;  %v956_v30 = vmul.f32 %v1741_v27, %v2029_v49 }
 0xf3e   :  { %v935_v32 = vmul.f32 %v1743_v29, %v2029_v49 }
 0xf3f   :  { %v957_v13 = vadd.f32 %v956_v30, %v2032_v53  ;;  %v181_v30 = vadd.f32 %v2076_v16, %v2022_v42 }
 0xf40   :  { %v936_v33 = vadd.f32 %v935_v32, %v2032_v53 }
 0xf41   :  { %960 = vrot.lane.b32.xlu0 %v957_v13, %s1819_s2  ;;  %v958_v35 = vmul.f32 %v957_v13, %v841_v59 }
 0xf42   :  { %939 = vrot.lane.b32.xlu1 %v936_v33, %s1819_s2  ;;  %v937_v40 = vmul.f32 %v936_v33, %v820_v62 }
 0xfb3   :  { %v961_v34 = vpop.permute.xlu0 %960 }
 0xfb4   :  { %v963_v36 = vmul.f32 %v961_v34, %v957_v13  ;;  %v940_v37 = vpop.permute.xlu1 %939 }
 0xfb5   :  { %v942_v38 = vmul.f32 %v940_v37, %v936_v33 }
 0xfb6   :  { %965 = vrot.lane.b32.xlu0 %v963_v36, %s1816_s23 }
 0xfb7   :  { %944 = vrot.lane.b32.xlu1 %v942_v38, %s1816_s23 }
0x1028   :  { %v966_v39 = vpop.permute.xlu0 %965 }
0x1029   :  { %v968_v41 = vadd.f32 %v966_v39, %v958_v35  ;;  %v945_v44 = vpop.permute.xlu1 %944 }
0x102a   :  { %v947_v45 = vadd.f32 %v945_v44, %v937_v40 }
0x102b   :  { %1744 = vtanh.f32 %v968_v41 }
0x102c   :  { %1746 = vtanh.f32 %v947_v45 }
0x1035   :  { %v1745_v46 = vpop.eup %1744 }
0x1036   :  { %v1747_v47 = vpop.eup %1746  ;;  %971 = vrot.lane.b32.xlu0 %v1745_v46, %s1819_s2 }
0x1037   :  { %950 = vrot.lane.b32.xlu1 %v1747_v47, %s1819_s2 }
0x10a8   :  { %v972_v3 = vpop.permute.xlu0 %971 }
0x10a9   :  { %v974_v48 = vmul.f32 %v972_v3, %v957_v13  ;;  %v951_v14 = vpop.permute.xlu1 %950 }
0x10aa   :  { %v953_v50 = vmul.f32 %v951_v14, %v936_v33 }
0x10ab   :  { %980 = vrot.lane.b32.xlu0 %v974_v48, %s1819_s2 }
0x10ac   :  { %976 = vrot.lane.b32.xlu1 %v953_v50, %s1816_s23 }
0x111d   :  { %v981_v51 = vpop.permute.xlu0 %980 }
0x111e   :  { %v977_v52 = vpop.permute.xlu1 %976 }
0x111f   :  { %v983_v54 = vsel %vm237_vm1, %v977_v52, %v981_v51 }
0x1120   :  { %1492 = vmatmul.mubr.msk.f32.vlgmr.msra.gmra.mrb[6].mxu1 %vm239_vm2, %v983_v54 }
0x1121   :  { %1674 = vmatpush1.bf16.msra.mxu1 %v1908_v7  ;;  %1305 = vmatprep.mubr.f32.mxu1 %v1817_v11 }
0x1122   :  { %1676 = vmatprep.subr.bf16.mxu1 %v1921_v12 }
0x1125   :  { %1678 = vmatpush1.bf16.msra.mxu1 %v1930_v15 }
0x1126   :  { %1680 = vmatprep.subr.bf16.mxu1 %v1939_v18 }
0x1129   :  { %1682 = vmatpush1.bf16.msra.mxu1 %v1961_v26 }
0x112a   :  { %1684 = vmatprep.subr.bf16.mxu1 %v1967_v28 }
0x112d   :  { %1686 = vmatpush1.bf16.msra.mxu1 %v1979_v31 }
0x11f3   :  { %v1053_v55 = vpop.f32.mrb[6].mxu1 }
0x11f4   :  { %v1054_v7 = vadd.f32 %v1053_v55, %v2025_v43  ;;  %v1055_v57 = vpop.f32.mrb[7].mxu1 }
0x11f5   :  { %v1056_v58 = vadd.f32 %v1055_v57, %v2094_v22 }
0x11f6   :  { %v1059_v12 = vadd.f32 %v1054_v7, %v176_v56 }
0x11f7   :  { %v1081_v15 = vmul.f32 %v1056_v58, %v2029_v49 }
0x11f8   :  { %v1060_v18 = vmul.f32 %v1059_v12, %v2029_v49 }
0x11f9   :  { %1748 = vtanh.f32 %v1081_v15 }
0x11fa   :  { %1750 = vtanh.f32 %v1060_v18 }
0x1203   :  { %v1749_v26 = vpop.eup %1748 }
0x1204   :  { %v1751_v28 = vpop.eup %1750  ;;  %v1083_v31 = vmul.f32 %v1749_v26, %v2029_v49 }
0x1205   :  { %v1062_v59 = vmul.f32 %v1751_v28, %v2029_v49 }
0x1206   :  { %v1084_v17 = vadd.f32 %v1083_v31, %v2032_v53 }
0x1207   :  { %v1063_v60 = vadd.f32 %v1062_v59, %v2032_v53 }
0x1208   :  { %1087 = vrot.lane.b32.xlu0 %v1084_v17, %s1819_s2  ;;  %v1085_v9 = vmul.f32 %v1084_v17, %v968_v41 }
0x1209   :  { %1066 = vrot.lane.b32.xlu1 %v1063_v60, %s1819_s2  ;;  %v1064_v2 = vmul.f32 %v1063_v60, %v947_v45 }
0x127a   :  { %v1088_v62 = vpop.permute.xlu0 %1087 }
0x127b   :  { %v1090_v61 = vmul.f32 %v1088_v62, %v1084_v17  ;;  %v1067_v63 = vpop.permute.xlu1 %1066 }
0x127c   :  { %v1069_v0 = vmul.f32 %v1067_v63, %v1063_v60 }
0x127d   :  { %1092 = vrot.lane.b32.xlu0 %v1090_v61, %s1816_s23 }
0x127e   :  { %1071 = vrot.lane.b32.xlu1 %v1069_v0, %s1816_s23 }
0x12ef   :  { %v1093_v1 = vpop.permute.xlu0 %1092 }
0x12f0   :  { %v1095_v4 = vadd.f32 %v1093_v1, %v1085_v9  ;;  %v1072_v5 = vpop.permute.xlu1 %1071  ;;  %v1820_v9 = vmov 0.0|0.0  }
0x12f1   :  { %v1074_v6 = vadd.f32 %v1072_v5, %v1064_v2  ;;  %1687 = vmatprep.subr.bf16.mxu0 %v1820_v9  ;;  %v1354_v2 = vld [vmem:[%s2355_s7 + $0x18] sm:$0xff] }
0x12f2   :  { %1752 = vtanh.f32 %v1095_v4 }
0x12f3   :  { %1754 = vtanh.f32 %v1074_v6 }
0x12fc   :  { %v1753_v8 = vpop.eup %1752 }
0x12fd   :  { %v1755_v19 = vpop.eup %1754  ;;  %1098 = vrot.lane.b32.xlu0 %v1753_v8, %s1819_s2 }
0x12fe   :  { %1077 = vrot.lane.b32.xlu1 %v1755_v19, %s1819_s2 }
0x136f   :  { %v1099_v20 = vpop.permute.xlu0 %1098 }
0x1370   :  { %v1101_v21 = vmul.f32 %v1099_v20, %v1084_v17  ;;  %v1078_v23 = vpop.permute.xlu1 %1077 }
0x1371   :  { %v1080_v24 = vmul.f32 %v1078_v23, %v1063_v60 }
0x1372   :  { %1107 = vrot.lane.b32.xlu0 %v1101_v21, %s1819_s2 }
0x1373   :  { %1103 = vrot.lane.b32.xlu1 %v1080_v24, %s1816_s23 }
0x13e4   :  { %v1108_v25 = vpop.permute.xlu0 %1107 }
0x13e5   :  { %v1104_v10 = vpop.permute.xlu1 %1103 }
0x13e6   :  { %v1110_v27 = vsel %vm237_vm1, %v1104_v10, %v1108_v25 }
0x13e7   :  { %1493 = vmatmul.mubr.msk.f32.vlgmr.msra.gmra.mrb[14].mxu0 %vm239_vm2, %v1110_v27 }
0x13e8   :  { %1536 = vmatprep.mubr.msk.f32.mxu0 %vm1821_vm6, %v1817_v11 }
0x14ba   :  { %v1180_v29 = vpop.f32.mrb[14].mxu0 }
0x14bb   :  { %v1181_v32 = vadd.f32 %v1180_v29, %v2025_v43  ;;  %v1182_v13 = vpop.f32.mrb[15].mxu0 }
0x14bc   :  { %v1183_v33 = vadd.f32 %v1182_v13, %v2094_v22 }
0x14bd   :  { %v1186_v34 = vadd.f32 %v1181_v32, %v181_v30 }
0x14be   :  { %v1208_v36 = vmul.f32 %v1183_v33, %v2029_v49 }
0x14bf   :  { %v1187_v37 = vmul.f32 %v1186_v34, %v2029_v49 }
0x14c0   :  { %1756 = vtanh.f32 %v1208_v36 }
0x14c1   :  { %1758 = vtanh.f32 %v1187_v37 }
0x14ca   :  { %v1757_v38 = vpop.eup %1756 }
0x14cb   :  { %v1759_v35 = vpop.eup %1758  ;;  %v1210_v39 = vmul.f32 %v1757_v38, %v2029_v49 }
0x14cc   :  { %v1189_v40 = vmul.f32 %v1759_v35, %v2029_v49 }
0x14cd   :  { %v1211_v42 = vadd.f32 %v1210_v39, %v2032_v53 }
0x14ce   :  { %v1190_v43 = vadd.f32 %v1189_v40, %v2032_v53 }
0x14cf   :  { %1214 = vrot.lane.b32.xlu0 %v1211_v42, %s1819_s2  ;;  %v1212_v46 = vmul.f32 %v1211_v42, %v1095_v4 }
0x14d0   :  { %1193 = vrot.lane.b32.xlu1 %v1190_v43, %s1819_s2  ;;  %v1191_v3 = vmul.f32 %v1190_v43, %v1074_v6 }
0x1541   :  { %v1215_v16 = vpop.permute.xlu0 %1214 }
0x1542   :  { %v1217_v41 = vmul.f32 %v1215_v16, %v1211_v42  ;;  %v1194_v44 = vpop.permute.xlu1 %1193 }
0x1543   :  { %v1196_v45 = vmul.f32 %v1194_v44, %v1190_v43 }
0x1544   :  { %1219 = vrot.lane.b32.xlu0 %v1217_v41, %s1816_s23 }
0x1545   :  { %1198 = vrot.lane.b32.xlu1 %v1196_v45, %s1816_s23 }
0x15b6   :  { %v1220_v47 = vpop.permute.xlu0 %1219 }
0x15b7   :  { %v1222_v48 = vadd.f32 %v1220_v47, %v1212_v46  ;;  %v1199_v14 = vpop.permute.xlu1 %1198 }
0x15b8   :  { %v1201_v50 = vadd.f32 %v1199_v14, %v1191_v3 }
0x15b9   :  { %1760 = vtanh.f32 %v1222_v48 }
0x15ba   :  { %1762 = vtanh.f32 %v1201_v50 }
0x15c3   :  { %v1761_v51 = vpop.eup %1760 }
0x15c4   :  { %v1763_v52 = vpop.eup %1762  ;;  %1225 = vrot.lane.b32.xlu0 %v1761_v51, %s1819_s2 }
0x15c5   :  { %1204 = vrot.lane.b32.xlu1 %v1763_v52, %s1819_s2 }
0x1636   :  { %v1226_v54 = vpop.permute.xlu0 %1225 }
0x1637   :  { %v1228_v55 = vmul.f32 %v1226_v54, %v1211_v42  ;;  %v1205_v56 = vpop.permute.xlu1 %1204 }
0x1638   :  { %v1207_v7 = vmul.f32 %v1205_v56, %v1190_v43 }
0x1639   :  { %1234 = vrot.lane.b32.xlu0 %v1228_v55, %s1819_s2 }
0x163a   :  { %1230 = vrot.lane.b32.xlu1 %v1207_v7, %s1816_s23 }
0x16ab   :  { %v1235_v57 = vpop.permute.xlu0 %1234 }
0x16ac   :  { %v1231_v58 = vpop.permute.xlu1 %1230 }
0x16ad   :  { %v1237_v12 = vsel %vm237_vm1, %v1231_v58, %v1235_v57  ;;  %1332 = vst.msk [vmem:[#allocation3] sm:$0xff] %vm237_vm1, %v1231_v58 }
0x16ae   :  { %1494 = vmatmul.mubr.msk.f32.vlgmr.msra.gmra.mrb[8].mxu1 %vm239_vm2, %v1237_v12 }
0x1781   :  { %v1307_v15 = vpop.f32.mrb[8].mxu1 }
0x1782   :  { %v1308_v18 = vpop.f32.mrb[9].mxu1 }
0x1783   :  { %v1309_v26 = vadd.f32 %v1308_v18, %v2094_v22  ;;  %v1351_v22 = vld [vmem:[%s2355_s7] sm:$0xff] }
0x1785   :  { %v1311_v28 = vmul.f32 %v1309_v26, %v2029_v49 }
0x1787   :  { %1764 = vtanh.f32 %v1311_v28 }
0x1791   :  { %v1765_v31 = vpop.eup %1764 }
0x1792   :  { %v1313_v59 = vmul.f32 %v1765_v31, %v2029_v49  ;;  %v1352_v49 = vld [vmem:[%s2355_s7 + $0x8] sm:$0xff] }
0x1793   :  { %v1688_v1 = vpack.c.bf16 %v1352_v49, %v1351_v22 }
0x1794   :  { %v1314_v17 = vadd.f32 %v1313_v59, %v2032_v53  ;;  %v1353_v53 = vld [vmem:[%s2355_s7 + $0x10] sm:$0xff]  ;;  %s1823_s7 = smov [#allocation3]  }
0x1795   :  { %1689 = vmatpush3.bf16.msra.mxu0 %v1688_v1  ;;  %v1691_v4 = vpack.c.bf16 %v1354_v2, %v1353_v53  ;;  %s1446_s28 = sshll.u32 %s1823_s7, 4  ;;  %s1447_s28 = int_to_ptr.vmem [resolvable:$true] %s1446_s28 }
0x1796   :  { %1317 = vrot.lane.b32.xlu1 %v1314_v17, %s1819_s2  ;;  %v1315_v61 = vmul.f32 %v1314_v17, %v1222_v48  ;;  %1690 = vmatprep.subr.bf16.mxu0 %v1820_v9  ;;  %s1768_s29 = scalar_lea.vmem %s1447_s28, 256  ;;  %p1773_p1 = scmp.lt.s32.totalorder %s1447_s28, %s1447_s28 }
0x1797   :  { %p1769_p0 = scmp.ne.s32.totalorder %s1447_s28, %s1768_s29  ;;  %p1774_p2 = scmp.lt.s32.totalorder %s1768_s29, %s1768_s29 }
0x1799   :  { %1692 = vmatpush3.bf16.msra.mxu0 %v1691_v4  ;;  %p1775_p3 = por %p1774_p2, %p1773_p1 }
0x179b   :  { %p1776_p4 = pnand %p1775_p3, %p1769_p0 }
0x1808   :  { %v1318_v60 = vpop.permute.xlu1 %1317 }
0x1809   :  { %v1320_v62 = vmul.f32 %v1318_v60, %v1314_v17 }
0x180b   :  { %1322 = vrot.lane.b32.xlu0 %v1320_v62, %s1816_s23 }
0x187d   :  { %v1323_v63 = vpop.permute.xlu0 %1322 }
0x187e   :  { %v1325_v0 = vadd.f32 %v1323_v63, %v1315_v61 }
0x1880   :  { %1766 = vtanh.f32 %v1325_v0 }
0x188a   :  { %v1767_v5 = vpop.eup %1766 }
0x188b   :  { %1328 = vrot.lane.b32.xlu1 %v1767_v5, %s1819_s2  ;;  %s1824_s2 = smov [#allocation5]  }
0x188c   :  { %s1458_s4 = sshll.u32 %s1824_s2, 4  ;;  %s2311_s4 = int_to_ptr.vmem [resolvable:$true] %s1458_s4 }
0x188f   :  { %1334 = vrot.lane.b32.xlu1 %v1201_v50, %s1822_s27 }
0x1893   :  { %1345 = vrot.lane.b32.xlu1 %v1325_v0, %s1822_s27 }
0x18fd   :  { %v1329_v6 = vpop.permute.xlu1 %1328 }
0x18fe   :  { %v1331_v8 = vmul.f32 %v1329_v6, %v1314_v17 }
0x1900   :  { %v1350_v19 = vmax.f32 %v1331_v8, 0.0 }
0x1901   :  { %v1335_v20 = vpop.permute.xlu1 %1334 }
0x1902   :  { %1337 = vst.msk [vmem:[#allocation5] sm:$0xff] %vm237_vm1, %v1335_v20  ;;  %1363 = vrot.lane.b32.xlu0 %v1350_v19, %s1816_s23 }
0x1905   :  { %v1346_v21 = vpop.permute.xlu1 %1345 }
0x1906   :  { %1349 = vst.msk [vmem:[#allocation5 + $0x8] sm:$0xff] %vm237_vm1, %v1346_v21  ;;  %1339 = vrot.lane.b32.xlu0 %v1331_v8, %s1816_s23 }
0x1974   :  { %v1364_v11 = vpop.permute.xlu0 %1363 }
0x1975   :  { %1537 = vmatmul.mubr.msk.f32.vlgmr.msra.gmra.mrb[16].mxu0 %vm237_vm1, %v1364_v11 }
0x1978   :  { %v1340_v23 = vpop.permute.xlu0 %1339 }
0x1979   :  { %1343 = vst.msk [vmem:[#allocation3 + $0x8] sm:$0xff] %vm237_vm1, %v1340_v23 }
0x197a   :  { %1779 = shalt.err (!%p1776_p4)
}
0x197b   :  { %s1780_s12 = scalar_lea.hbm %s2358_s10, 256 }
0x197c   :  { %p1781_p5 = scmp.ne.s32.totalorder %s2358_s10, %s1780_s12  ;;  %p1784_p6 = scmp.lt.u32.totalorder %s1780_s12, %s2358_s10 }
0x197e   :  { %p1786_p7 = pnand %p1784_p6, %p1781_p5 }
0x1980   :  { %1789 = shalt.err (!%p1786_p7)
}
0x1981   :  { %s1825_s16 = smov 128   ;;  %s1826_s17 = smov 8  }
0x1982   :  { %1452 = dma.vmem_to_hbm [thread:$0]  %s1447_s28, 256, %s2358_s10, [#allocation4], %s1825_s16, %s1825_s16, %s1826_s17  }
0x1983   :  { %s1790_s0 = scalar_lea.vmem %s2311_s4, 256  ;;  %p1795_p9 = scmp.lt.s32.totalorder %s2311_s4, %s2311_s4 }
0x1984   :  { %p1791_p8 = scmp.ne.s32.totalorder %s2311_s4, %s1790_s0  ;;  %p1796_p10 = scmp.lt.s32.totalorder %s1790_s0, %s1790_s0 }
0x1986   :  { %p1797_p11 = por %p1796_p10, %p1795_p9 }
0x1988   :  { %p1798_p12 = pnand %p1797_p11, %p1791_p8 }
0x198a   :  { %1801 = shalt.err (!%p1798_p12)
}
0x198b   :  { %s1802_s21 = scalar_lea.hbm %s2359_s11, 256 }
0x198c   :  { %p1803_p13 = scmp.ne.s32.totalorder %s2359_s11, %s1802_s21  ;;  %p1806_p0 = scmp.lt.u32.totalorder %s1802_s21, %s2359_s11 }
0x198e   :  { %p1808_p1 = pnand %p1806_p0, %p1803_p13 }
0x1990   :  { %1811 = shalt.err (!%p1808_p1)
}
0x1991   :  { %1464 = dma.vmem_to_hbm [thread:$0]  %s2311_s4, 256, %s2359_s11, [#allocation6], %s1825_s16, %s1825_s16, %s1826_s17   ;;  %vm1437_vm7 = vcmask 31744  }
0x1992   :  { %v1495_v24 = vld [vmem:[%s2356_s8] ss:$0 sm:$0xff] }
0x1a48   :  { %v1433_v25 = vpop.f32.mrb[16].mxu0 }
0x1a49   :  { %v1434_v10 = vadd.f32 %v1495_v24, %v1433_v25  ;;  %v1538_v27 = vpop.f32.mrb[17].mxu0 }
0x1a4b   :  { %1438 = vst.msk [vmem:[%s2357_s9] sm:$0xff] %vm1437_vm7, %v1434_v10 }
0x1a4c   :  { %1812 = dma.done.wait [#allocation4], 256  }
0x1a4d   :  { %1813 = vsyncadd [#allocation4], 4294967040 }
0x1a4e   :  { %1814 = dma.done.wait [#allocation6], 256  }
0x1a4f   :  { %1815 = vsyncadd [#allocation6], 4294967040 }
0x1a50   :  { %1473 = vsyncpa [#allocation4], 1 }
0x1a51   :  { %1474 = vsyncpa [#allocation6], 1 }

</bundles_post_ra>
